<compile_context>
chip_gen: v6e
topology: v6e:2x2x1
jax: 0.10.0
libtpu: 0.0.40
codegen_flags: <defaults>
</compile_context>

<pallas_src>
import numpy as np
import jax
import jax.numpy as jnp
from jax.experimental import pallas as pl
from jax.experimental.pallas import tpu as pltpu

LANE = 128


# ----------------------------------------------------------------------------
# diffusion buffers (registered in __init__, not used in forward; kept for fidelity)
# ----------------------------------------------------------------------------
def cosine_beta_schedule(timesteps, s=0.008):
    steps = timesteps + 1
    x = np.linspace(0, timesteps, steps)
    alphas_cumprod = np.cos((x / timesteps + s) / (1 + s) * np.pi * 0.5) ** 2
    alphas_cumprod = alphas_cumprod / alphas_cumprod[0]
    betas = 1 - alphas_cumprod[1:] / alphas_cumprod[:-1]
    return np.clip(betas, 0.0001, 0.9999)


def _round_up(n, m):
    return ((n + m - 1) // m) * m


def _pad2d(x, rows, cols):
    r, c = x.shape
    return jnp.pad(x, ((0, rows - r), (0, cols - c)))


# ----------------------------------------------------------------------------
# Fused Pallas kernel: GCN branches + pool + timestep MLP + noise predictor
# ----------------------------------------------------------------------------
def _make_policy_kernel(H, F_pad, A_pad, B, offs):
    """Kernel closure over static dims and weight-stack row offsets."""
    f32, bf16 = jnp.float32, jnp.bfloat16

    def kernel(adj_p_ref, x_p_ref, pool_ref, adj_m_ref, x_m_ref, gather_ref,
               na_ref, wstack_ref, rows_ref, out_ref):
        # --- static slices of the single packed bf16 weight stack ----------
        def w(name, nrows, ncols=H):
            o = offs[name]
            return wstack_ref[o:o + nrows, :ncols]

        # --- packed small f32 rows: [wt1, biases..., t bcast, 1/count bcast]
        rows = rows_ref[...]
        wt1 = rows[0:1, :H]
        bt1 = rows[1:2, :H]
        bt2 = rows[2:3, :H]
        pb1 = rows[3:4, :H]
        pb2 = rows[4:5, :H]
        mb1 = rows[5:6, :H]
        mb2 = rows[6:7, :H]
        bn1 = rows[7:8, :H]
        bn2 = rows[8:9, :A_pad]
        t_b = rows[9:9 + B, :H]                 # row b == t[b] (lane-broadcast)
        invc = rows[9 + B:9 + 2 * B, :H]        # row b == 1/|protein graph b|

        def gcn2(adj_ref, x_ref, w1, b1, w2, b2):
            # relu(A_norm @ (x W1) + b1) -> relu(A_norm @ (h W2) + b2)
            adj = adj_ref[...]                                              # bf16
            xw = jnp.dot(x_ref[...], w1, preferred_element_type=f32)
            h = jnp.dot(adj, xw.astype(bf16), preferred_element_type=f32) + b1
            h = jnp.maximum(h, 0.0)
            hw = jnp.dot(h.astype(bf16), w2, preferred_element_type=f32)
            h2 = jnp.dot(adj, hw.astype(bf16), preferred_element_type=f32) + b2
            return jnp.maximum(h2, 0.0)

        # protein branch: only the pooled graph embedding is needed.
        hp = gcn2(adj_p_ref, x_p_ref, w("pw1", F_pad), pb1, w("pw2", H), pb2)
        # global_mean_pool = 0/1 one-hot bf16 matmul, then exact f32 1/count scale.
        p_emb = jnp.dot(pool_ref[...], hp.astype(bf16),
                        preferred_element_type=f32) * invc                  # (B, H)

        # molecule branch: only the node embedding is needed.
        hm = gcn2(adj_m_ref, x_m_ref, w("mw1", F_pad), mb1, w("mw2", H), mb2)

        # timestep embedding: Linear(1,H) (broadcast multiply) -> ReLU -> Linear(H,H)
        t_h = jnp.maximum(t_b * wt1 + bt1, 0.0)                             # (B, H)
        t_emb = jnp.dot(t_h.astype(bf16), w("wt2", H),
                        preferred_element_type=f32) + bt2                   # (B, H)

        # noise-predictor layer 1, K=256-fused partial matmuls; graph-level
        # terms are projected BEFORE the per-node gather (B << Nm).
        graph_in = jnp.concatenate([p_emb, t_emb], axis=-1).astype(bf16)    # (B, 2H)
        graph_proj = jnp.dot(graph_in, w("w_graph", 2 * H),
                             preferred_element_type=f32)                    # (B, H)
        node_proj = jnp.dot(gather_ref[...], graph_proj.astype(bf16),
                            preferred_element_type=f32)                     # (Nm, H)

        node_in = jnp.concatenate([hm.astype(bf16), na_ref[...]], axis=-1)  # (Nm, H+A)
        h1 = jnp.maximum(jnp.dot(node_in, w("w_node", H + A_pad),
                                 preferred_element_type=f32)
                         + node_proj + bn1, 0.0)
        out_ref[...] = jnp.dot(h1.astype(bf16), w("wn2", H, A_pad),
                               preferred_element_type=f32) + bn2            # (Nm, A_pad)

    return kernel


_VMEM = pl.BlockSpec(memory_space=pltpu.MemorySpace.VMEM)


# ----------------------------------------------------------------------------
# Glue: graph preprocessing + parameter construction
# ----------------------------------------------------------------------------
def build_norm_adj(edge_index, num_nodes):
    """Dense GCN-normalized adjacency: D^-1/2 (A + I) D^-1/2 (self-loops added)."""
    src, dst = edge_index
    adj = jnp.zeros((num_nodes, num_nodes), jnp.float32)
    adj = adj.at[dst, src].set(1.0)
    adj = adj + jnp.eye(num_nodes, dtype=jnp.float32)
    deg = adj.sum(axis=1)
    dinv = 1.0 / jnp.sqrt(deg)
    return adj * dinv[:, None] * dinv[None, :]


def build_pool_onehot(batch, num_graphs):
    """P[b, i] = 1 if node i in graph b (exact 0/1, bf16-safe)."""
    return (batch[None, :] == jnp.arange(num_graphs)[:, None]).astype(jnp.float32)


def build_pool_matrix(batch, num_graphs):
    """Mean-pool matrix (reference path only)."""
    onehot = build_pool_onehot(batch, num_graphs)
    counts = onehot.sum(axis=1, keepdims=True)
    return onehot / counts


def build_gather_matrix(batch, num_graphs):
    """G[n, b] = 1 if molecule node n belongs to graph b (exact 0/1)."""
    return (batch[:, None] == jnp.arange(num_graphs)[None, :]).astype(jnp.float32)


def init_params(key, residue_vocab_size, hidden_dim, action_dim):
    in_ch = residue_vocab_size + 3
    ks = jax.random.split(key, 16)
    s = 0.1

    def w(k, shape):
        return jax.random.normal(k, shape, jnp.float32) * s

    p = {
        # protein GCN
        "pw1": w(ks[0], (in_ch, hidden_dim)), "pb1": w(ks[1], (1, hidden_dim)),
        "pw2": w(ks[2], (hidden_dim, hidden_dim)), "pb2": w(ks[3], (1, hidden_dim)),
        # molecule GCN
        "mw1": w(ks[4], (in_ch, hidden_dim)), "mb1": w(ks[5], (1, hidden_dim)),
        "mw2": w(ks[6], (hidden_dim, hidden_dim)), "mb2": w(ks[7], (1, hidden_dim)),
        # timestep embedding MLP: Linear(1,H), Linear(H,H)
        "wt1": w(ks[8], (1, hidden_dim)), "bt1": w(ks[9], (1, hidden_dim)),
        "wt2": w(ks[10], (hidden_dim, hidden_dim)), "bt2": w(ks[11], (1, hidden_dim)),
        # noise predictor: Linear(3H + A, H), Linear(H, A)
        "bn1": w(ks[13], (1, hidden_dim)),
        "wn2": w(ks[14], (hidden_dim, action_dim)), "bn2": w(ks[15], (1, action_dim)),
    }
    wn1 = w(ks[12], (3 * hidden_dim + action_dim, hidden_dim))
    # row-block split of wn1 matching concat([x_m, p_emb, t_emb, noisy_action])
    h = hidden_dim
    p["wn1_xm"] = wn1[0:h]
    p["wn1_p"] = wn1[h:2 * h]
    p["wn1_t"] = wn1[2 * h:3 * h]
    p["wn1_a"] = wn1[3 * h:]
    return p


def diffusion_policy_forward(params, protein, molecule, t, noisy_action,
                             residue_vocab_size, hidden_dim, action_dim):
    """protein/molecule: dicts with residue_name (N,), pos (N,3), edge_index (2,E), batch (N,)."""
    f32, bf16 = jnp.float32, jnp.bfloat16
    B = t.shape[0]
    H = hidden_dim
    F = residue_vocab_size + 3
    F_pad = _round_up(F, LANE)
    A_pad = _round_up(action_dim, LANE)
    W = max(H, A_pad)
    Np = protein["residue_name"].shape[0]
    Nm = molecule["residue_name"].shape[0]
    # 128-multiples: bf16 sublane-pack friendly, lane-aligned adjacency, full MXU tiles.
    Np_pad = _round_up(Np, LANE)
    Nm_pad = _round_up(Nm, LANE)

    def node_features(g, n_pad):
        oh = jax.nn.one_hot(g["residue_name"], residue_vocab_size, dtype=f32)
        x = jnp.concatenate([oh, g["pos"].astype(f32)], axis=1)
        return _pad2d(x, n_pad, F_pad)                      # zero-pad lanes to 128

    adj_p = _pad2d(build_norm_adj(protein["edge_index"], Np), Np_pad, Np_pad)
    adj_m = _pad2d(build_norm_adj(molecule["edge_index"], Nm), Nm_pad, Nm_pad)
    pool_oh = build_pool_onehot(protein["batch"], B)         # (B, Np) exact 0/1
    counts_p = pool_oh.sum(axis=1)                           # (B,)
    pool_oh = _pad2d(pool_oh, B, Np_pad)
    gather = _pad2d(build_gather_matrix(molecule["batch"], B), Nm_pad, B)
    x_p = node_features(protein, Np_pad)
    x_m = node_features(molecule, Nm_pad)
    na = _pad2d(noisy_action.astype(f32), Nm_pad, A_pad)

    # --- packed small f32 rows: wt1 + biases + t broadcast + 1/count broadcast ---
    rows = jnp.zeros((9 + 2 * B, W), f32)
    for i, name in enumerate(["wt1", "bt1", "bt2", "pb1", "pb2",
                              "mb1", "mb2", "bn1", "bn2"]):
        v = params[name]
        rows = rows.at[i, :v.shape[1]].set(v[0])
    rows = rows.at[9:9 + B, :].set(t.astype(f32)[:, None])
    rows = rows.at[9 + B:9 + 2 * B, :].set((1.0 / counts_p)[:, None])

    # --- ONE stacked bf16 weight array, sliced at static offsets in-kernel ---
    blocks = [
        ("pw1", _pad2d(params["pw1"], F_pad, H)),
        ("pw2", params["pw2"]),
        ("mw1", _pad2d(params["mw1"], F_pad, H)),
        ("mw2", params["mw2"]),
        ("wt2", params["wt2"]),
        # K=256-fused head layer 1: [wn1_xm; wn1_a] and [wn1_p; wn1_t]
        ("w_node", jnp.concatenate(
            [params["wn1_xm"], _pad2d(params["wn1_a"], A_pad, H)], axis=0)),
        ("w_graph", jnp.concatenate([params["wn1_p"], params["wn1_t"]], axis=0)),
        ("wn2", _pad2d(params["wn2"], H, A_pad)),
    ]
    offs, parts, off = {}, [], 0
    for name, m in blocks:
        offs[name] = off
        off += m.shape[0]
        parts.append(jnp.pad(m, ((0, 0), (0, W - m.shape[1]))))
    wstack = jnp.concatenate(parts, axis=0).astype(bf16)

    inputs = (
        adj_p.astype(bf16), x_p.astype(bf16), pool_oh.astype(bf16),
        adj_m.astype(bf16), x_m.astype(bf16), gather.astype(bf16),
        na.astype(bf16), wstack, rows,
    )

    total_bytes = sum(int(np.prod(a.shape)) * a.dtype.itemsize for a in inputs)
    total_bytes += Nm_pad * A_pad * 4                        # f32 output
    vmem_limit = int(min(64 << 20, max(4 * total_bytes + (8 << 20), 32 << 20)))

    # TODO(synk): for large graphs (N >~ 2k) row-tile the dense adjacency
    # matmuls (adj in memory_space=pl.ANY + pltpu.emit_pipeline over (tm, N)
    # row tiles) so the (N, N) adjacency never sits whole in VMEM (16 MiB
    # scoped default on v5e, 64 MiB physical on v7x) and its HBM DMA overlaps
    # MXU compute.
    # TODO(synk): on v7x, add a 2-wide "parallel" grid axis running the
    # protein branch on one TensorCore and the molecule branch + head on the
    # other (p_emb exchanged via shared scratch) to use both cores.
    kernel = _make_policy_kernel(H, F_pad, A_pad, B, offs)
    out = pl.pallas_call(
        kernel,
        out_shape=jax.ShapeDtypeStruct((Nm_pad, A_pad), f32),
        in_specs=[_VMEM] * len(inputs),
        out_specs=_VMEM,
        compiler_params=pltpu.CompilerParams(vmem_limit_bytes=vmem_limit),
    )(*inputs)
    return out[:Nm, :action_dim]


# ----------------------------------------------------------------------------
# Pure-JAX reference (for a correctness check) — f32 end-to-end
# ----------------------------------------------------------------------------
def reference_forward(params, protein, molecule, t, noisy_action,
                      residue_vocab_size, hidden_dim):
    num_graphs = t.shape[0]

    def branch(g, w1, b1, w2, b2):
        oh = jax.nn.one_hot(g["residue_name"], residue_vocab_size, dtype=jnp.float32)
        x = jnp.concatenate([oh, g["pos"].astype(jnp.float32)], axis=1)
        adj = build_norm_adj(g["edge_index"], x.shape[0])
        x = jax.nn.relu(adj @ (x @ w1) + b1)
        x = jax.nn.relu(adj @ (x @ w2) + b2)
        pool = build_pool_matrix(g["batch"], num_graphs)
        return x, pool @ x

    _, p_emb = branch(protein, params["pw1"], params["pb1"], params["pw2"], params["pb2"])
    x_m, _ = branch(molecule, params["mw1"], params["mb1"], params["mw2"], params["mb2"])

    t_col = t.astype(jnp.float32)[:, None]
    t_emb = jax.nn.relu(t_col @ params["wt1"] + params["bt1"]) @ params["wt2"] + params["bt2"]
    mb = molecule["batch"]
    feats = jnp.concatenate([x_m, p_emb[mb], t_emb[mb],
                             noisy_action.astype(jnp.float32)], axis=1)
    wn1 = jnp.concatenate([params["wn1_xm"], params["wn1_p"],
                           params["wn1_t"], params["wn1_a"]], axis=0)
    h = jax.nn.relu(feats @ wn1 + params["bn1"])
    return h @ params["wn2"] + params["bn2"]


# ----------------------------------------------------------------------------
def make_chain_graph(nodes_per_graph, num_graphs, key, vocab):
    n = nodes_per_graph * num_graphs
    res = jax.random.randint(key, (n,), 0, vocab)
    pos = jax.random.normal(jax.random.fold_in(key, 1), (n, 3), jnp.float32)
    src, dst = [], []
    for g in range(num_graphs):
        off = g * nodes_per_graph
        for i in range(nodes_per_graph - 1):
            src += [off + i, off + i + 1]
            dst += [off + i + 1, off + i]
    edge_index = jnp.array([src, dst], dtype=jnp.int32)
    batch = jnp.repeat(jnp.arange(num_graphs, dtype=jnp.int32), nodes_per_graph)
    return {"residue_name": res, "pos": pos, "edge_index": edge_index, "batch": batch}


if __name__ == "__main__":
    residue_vocab_size = 20
    hidden_dim = 128          # module default; keeps every matmul dim MXU/lane aligned
    action_dim = 3
    diffusion_steps = 50

    # buffers from __init__ (unused by forward, computed for fidelity)
    betas = jnp.asarray(cosine_beta_schedule(diffusion_steps), jnp.float32)
    alphas_cumprod = jnp.cumprod(1.0 - betas)
    _ = jnp.sqrt(alphas_cumprod), jnp.sqrt(1.0 - alphas_cumprod)

    key = jax.random.PRNGKey(0)
    k_param, k_prot, k_mol, k_t, k_na = jax.random.split(key, 5)

    num_graphs = 2
    protein = make_chain_graph(8, num_graphs, k_prot, residue_vocab_size)   # 16 protein nodes
    molecule = make_chain_graph(4, num_graphs, k_mol, residue_vocab_size)   # 8 molecule nodes

    t = jax.random.randint(k_t, (num_graphs,), 0, diffusion_steps)
    noisy_action = jax.random.normal(k_na, (molecule["residue_name"].shape[0], action_dim),
                                     jnp.float32)

    params = init_params(k_param, residue_vocab_size, hidden_dim, action_dim)

    out = diffusion_policy_forward(params, protein, molecule, t, noisy_action,
                                   residue_vocab_size, hidden_dim, action_dim)
    out = jax.block_until_ready(out)

    ref = reference_forward(params, protein, molecule, t, noisy_action,
                            residue_vocab_size, hidden_dim)
    ref = jax.block_until_ready(ref)

    assert out.shape == (molecule["residue_name"].shape[0], action_dim)
    np.testing.assert_allclose(np.asarray(out), np.asarray(ref), rtol=5e-2, atol=5e-2)
    print("KERNEL_OK")
</pallas_src>

<mosaic_0001>
module attributes {stable_mosaic.version = 11 : i64} {
  func.func @kernel(%arg0: memref<128x128xbf16, #tpu.memory_space<vmem>>, %arg1: memref<128x128xbf16, #tpu.memory_space<vmem>>, %arg2: memref<2x128xbf16, #tpu.memory_space<vmem>>, %arg3: memref<128x128xbf16, #tpu.memory_space<vmem>>, %arg4: memref<128x128xbf16, #tpu.memory_space<vmem>>, %arg5: memref<128x2xbf16, #tpu.memory_space<vmem>>, %arg6: memref<128x128xbf16, #tpu.memory_space<vmem>>, %arg7: memref<1280x128xbf16, #tpu.memory_space<vmem>>, %arg8: memref<13x128xf32, #tpu.memory_space<vmem>>, %arg9: memref<128x128xf32, #tpu.memory_space<vmem>>) attributes {dimension_semantics = [], scalar_prefetch = 0 : i64, scratch_operands = 0 : i64, tpu.core_type = #tpu.core_type<tc>} {
    %c0 = arith.constant 0 : index
    %c0_0 = arith.constant 0 : index
    %0 = vector.load %arg8[%c0, %c0_0] : memref<13x128xf32, #tpu.memory_space<vmem>>, vector<13x128xf32>
    %1 = vector.extract_strided_slice %0 {offsets = [0, 0], sizes = [1, 128], strides = [1, 1]} : vector<13x128xf32> to vector<1x128xf32>
    %2 = vector.extract_strided_slice %0 {offsets = [1, 0], sizes = [1, 128], strides = [1, 1]} : vector<13x128xf32> to vector<1x128xf32>
    %3 = vector.extract_strided_slice %0 {offsets = [2, 0], sizes = [1, 128], strides = [1, 1]} : vector<13x128xf32> to vector<1x128xf32>
    %4 = vector.extract_strided_slice %0 {offsets = [3, 0], sizes = [1, 128], strides = [1, 1]} : vector<13x128xf32> to vector<1x128xf32>
    %5 = vector.extract_strided_slice %0 {offsets = [4, 0], sizes = [1, 128], strides = [1, 1]} : vector<13x128xf32> to vector<1x128xf32>
    %6 = vector.extract_strided_slice %0 {offsets = [5, 0], sizes = [1, 128], strides = [1, 1]} : vector<13x128xf32> to vector<1x128xf32>
    %7 = vector.extract_strided_slice %0 {offsets = [6, 0], sizes = [1, 128], strides = [1, 1]} : vector<13x128xf32> to vector<1x128xf32>
    %8 = vector.extract_strided_slice %0 {offsets = [7, 0], sizes = [1, 128], strides = [1, 1]} : vector<13x128xf32> to vector<1x128xf32>
    %9 = vector.extract_strided_slice %0 {offsets = [8, 0], sizes = [1, 128], strides = [1, 1]} : vector<13x128xf32> to vector<1x128xf32>
    %10 = vector.extract_strided_slice %0 {offsets = [9, 0], sizes = [2, 128], strides = [1, 1]} : vector<13x128xf32> to vector<2x128xf32>
    %11 = vector.extract_strided_slice %0 {offsets = [11, 0], sizes = [2, 128], strides = [1, 1]} : vector<13x128xf32> to vector<2x128xf32>
    %c0_1 = arith.constant 0 : index
    %c0_2 = arith.constant 0 : index
    %12 = vector.load %arg7[%c0_1, %c0_2] : memref<1280x128xbf16, #tpu.memory_space<vmem>>, vector<128x128xbf16>
    %c128 = arith.constant 128 : index
    %c0_3 = arith.constant 0 : index
    %13 = vector.load %arg7[%c128, %c0_3] : memref<1280x128xbf16, #tpu.memory_space<vmem>>, vector<128x128xbf16>
    %c0_4 = arith.constant 0 : index
    %c0_5 = arith.constant 0 : index
    %14 = vector.load %arg0[%c0_4, %c0_5] : memref<128x128xbf16, #tpu.memory_space<vmem>>, vector<128x128xbf16>
    %c0_6 = arith.constant 0 : index
    %c0_7 = arith.constant 0 : index
    %15 = vector.load %arg1[%c0_6, %c0_7] : memref<128x128xbf16, #tpu.memory_space<vmem>>, vector<128x128xbf16>
    %cst = arith.constant dense<0.000000e+00> : vector<128x128xf32>
    %16 = tpu.matmul %15, %12, %cst {dimension_numbers = #tpu.dot_dimension_numbers<[1], [0], [0], [1], [0, 0, 1, 1], [], []>} : vector<128x128xbf16>, vector<128x128xbf16>, vector<128x128xf32> -> vector<128x128xf32>
    %17 = arith.truncf %16 : vector<128x128xf32> to vector<128x128xbf16>
    %cst_8 = arith.constant dense<0.000000e+00> : vector<128x128xf32>
    %18 = tpu.matmul %14, %17, %cst_8 {dimension_numbers = #tpu.dot_dimension_numbers<[1], [0], [0], [1], [0, 0, 1, 1], [], []>} : vector<128x128xbf16>, vector<128x128xbf16>, vector<128x128xf32> -> vector<128x128xf32>
    %19 = vector.broadcast %4 : vector<1x128xf32> to vector<128x128xf32>
    %20 = arith.addf %18, %19 : vector<128x128xf32>
    %cst_9 = arith.constant 0.000000e+00 : f32
    %21 = vector.broadcast %cst_9 : f32 to vector<128x128xf32>
    %22 = arith.maximumf %20, %21 : vector<128x128xf32>
    %23 = arith.truncf %22 : vector<128x128xf32> to vector<128x128xbf16>
    %cst_10 = arith.constant dense<0.000000e+00> : vector<128x128xf32>
    %24 = tpu.matmul %23, %13, %cst_10 {dimension_numbers = #tpu.dot_dimension_numbers<[1], [0], [0], [1], [0, 0, 1, 1], [], []>} : vector<128x128xbf16>, vector<128x128xbf16>, vector<128x128xf32> -> vector<128x128xf32>
    %25 = arith.truncf %24 : vector<128x128xf32> to vector<128x128xbf16>
    %cst_11 = arith.constant dense<0.000000e+00> : vector<128x128xf32>
    %26 = tpu.matmul %14, %25, %cst_11 {dimension_numbers = #tpu.dot_dimension_numbers<[1], [0], [0], [1], [0, 0, 1, 1], [], []>} : vector<128x128xbf16>, vector<128x128xbf16>, vector<128x128xf32> -> vector<128x128xf32>
    %27 = vector.broadcast %5 : vector<1x128xf32> to vector<128x128xf32>
    %28 = arith.addf %26, %27 : vector<128x128xf32>
    %cst_12 = arith.constant 0.000000e+00 : f32
    %29 = vector.broadcast %cst_12 : f32 to vector<128x128xf32>
    %30 = arith.maximumf %28, %29 : vector<128x128xf32>
    %c0_13 = arith.constant 0 : index
    %c0_14 = arith.constant 0 : index
    %31 = vector.load %arg2[%c0_13, %c0_14] : memref<2x128xbf16, #tpu.memory_space<vmem>>, vector<2x128xbf16>
    %32 = arith.truncf %30 : vector<128x128xf32> to vector<128x128xbf16>
    %cst_15 = arith.constant dense<0.000000e+00> : vector<2x128xf32>
    %33 = tpu.matmul %31, %32, %cst_15 {dimension_numbers = #tpu.dot_dimension_numbers<[1], [0], [0], [1], [0, 0, 1, 1], [], []>} : vector<2x128xbf16>, vector<128x128xbf16>, vector<2x128xf32> -> vector<2x128xf32>
    %34 = arith.mulf %33, %11 : vector<2x128xf32>
    %c256 = arith.constant 256 : index
    %c0_16 = arith.constant 0 : index
    %35 = vector.load %arg7[%c256, %c0_16] : memref<1280x128xbf16, #tpu.memory_space<vmem>>, vector<128x128xbf16>
    %c384 = arith.constant 384 : index
    %c0_17 = arith.constant 0 : index
    %36 = vector.load %arg7[%c384, %c0_17] : memref<1280x128xbf16, #tpu.memory_space<vmem>>, vector<128x128xbf16>
    %c0_18 = arith.constant 0 : index
    %c0_19 = arith.constant 0 : index
    %37 = vector.load %arg3[%c0_18, %c0_19] : memref<128x128xbf16, #tpu.memory_space<vmem>>, vector<128x128xbf16>
    %c0_20 = arith.constant 0 : index
    %c0_21 = arith.constant 0 : index
    %38 = vector.load %arg4[%c0_20, %c0_21] : memref<128x128xbf16, #tpu.memory_space<vmem>>, vector<128x128xbf16>
    %cst_22 = arith.constant dense<0.000000e+00> : vector<128x128xf32>
    %39 = tpu.matmul %38, %35, %cst_22 {dimension_numbers = #tpu.dot_dimension_numbers<[1], [0], [0], [1], [0, 0, 1, 1], [], []>} : vector<128x128xbf16>, vector<128x128xbf16>, vector<128x128xf32> -> vector<128x128xf32>
    %40 = arith.truncf %39 : vector<128x128xf32> to vector<128x128xbf16>
    %cst_23 = arith.constant dense<0.000000e+00> : vector<128x128xf32>
    %41 = tpu.matmul %37, %40, %cst_23 {dimension_numbers = #tpu.dot_dimension_numbers<[1], [0], [0], [1], [0, 0, 1, 1], [], []>} : vector<128x128xbf16>, vector<128x128xbf16>, vector<128x128xf32> -> vector<128x128xf32>
    %42 = vector.broadcast %6 : vector<1x128xf32> to vector<128x128xf32>
    %43 = arith.addf %41, %42 : vector<128x128xf32>
    %cst_24 = arith.constant 0.000000e+00 : f32
    %44 = vector.broadcast %cst_24 : f32 to vector<128x128xf32>
    %45 = arith.maximumf %43, %44 : vector<128x128xf32>
    %46 = arith.truncf %45 : vector<128x128xf32> to vector<128x128xbf16>
    %cst_25 = arith.constant dense<0.000000e+00> : vector<128x128xf32>
    %47 = tpu.matmul %46, %36, %cst_25 {dimension_numbers = #tpu.dot_dimension_numbers<[1], [0], [0], [1], [0, 0, 1, 1], [], []>} : vector<128x128xbf16>, vector<128x128xbf16>, vector<128x128xf32> -> vector<128x128xf32>
    %48 = arith.truncf %47 : vector<128x128xf32> to vector<128x128xbf16>
    %cst_26 = arith.constant dense<0.000000e+00> : vector<128x128xf32>
    %49 = tpu.matmul %37, %48, %cst_26 {dimension_numbers = #tpu.dot_dimension_numbers<[1], [0], [0], [1], [0, 0, 1, 1], [], []>} : vector<128x128xbf16>, vector<128x128xbf16>, vector<128x128xf32> -> vector<128x128xf32>
    %50 = vector.broadcast %7 : vector<1x128xf32> to vector<128x128xf32>
    %51 = arith.addf %49, %50 : vector<128x128xf32>
    %cst_27 = arith.constant 0.000000e+00 : f32
    %52 = vector.broadcast %cst_27 : f32 to vector<128x128xf32>
    %53 = arith.maximumf %51, %52 : vector<128x128xf32>
    %54 = vector.broadcast %1 : vector<1x128xf32> to vector<2x128xf32>
    %55 = arith.mulf %10, %54 : vector<2x128xf32>
    %56 = vector.broadcast %2 : vector<1x128xf32> to vector<2x128xf32>
    %57 = arith.addf %55, %56 : vector<2x128xf32>
    %cst_28 = arith.constant 0.000000e+00 : f32
    %58 = vector.broadcast %cst_28 : f32 to vector<2x128xf32>
    %59 = arith.maximumf %57, %58 : vector<2x128xf32>
    %60 = arith.truncf %59 : vector<2x128xf32> to vector<2x128xbf16>
    %c512 = arith.constant 512 : index
    %c0_29 = arith.constant 0 : index
    %61 = vector.load %arg7[%c512, %c0_29] : memref<1280x128xbf16, #tpu.memory_space<vmem>>, vector<128x128xbf16>
    %cst_30 = arith.constant dense<0.000000e+00> : vector<2x128xf32>
    %62 = tpu.matmul %60, %61, %cst_30 {dimension_numbers = #tpu.dot_dimension_numbers<[1], [0], [0], [1], [0, 0, 1, 1], [], []>} : vector<2x128xbf16>, vector<128x128xbf16>, vector<2x128xf32> -> vector<2x128xf32>
    %63 = vector.broadcast %3 : vector<1x128xf32> to vector<2x128xf32>
    %64 = arith.addf %62, %63 : vector<2x128xf32>
    %65 = tpu.concatenate %34, %64 in 1 : vector<2x128xf32>, vector<2x128xf32> -> vector<2x256xf32>
    %66 = arith.truncf %65 : vector<2x256xf32> to vector<2x256xbf16>
    %c896 = arith.constant 896 : index
    %c0_31 = arith.constant 0 : index
    %67 = vector.load %arg7[%c896, %c0_31] : memref<1280x128xbf16, #tpu.memory_space<vmem>>, vector<256x128xbf16>
    %cst_32 = arith.constant dense<0.000000e+00> : vector<2x128xf32>
    %68 = tpu.matmul %66, %67, %cst_32 {dimension_numbers = #tpu.dot_dimension_numbers<[1], [0], [0], [1], [0, 0, 1, 1], [], []>} : vector<2x256xbf16>, vector<256x128xbf16>, vector<2x128xf32> -> vector<2x128xf32>
    %c0_33 = arith.constant 0 : index
    %c0_34 = arith.constant 0 : index
    %69 = vector.load %arg5[%c0_33, %c0_34] : memref<128x2xbf16, #tpu.memory_space<vmem>>, vector<128x2xbf16>
    %70 = arith.truncf %68 : vector<2x128xf32> to vector<2x128xbf16>
    %cst_35 = arith.constant dense<0.000000e+00> : vector<128x128xf32>
    %71 = tpu.matmul %69, %70, %cst_35 {dimension_numbers = #tpu.dot_dimension_numbers<[1], [0], [0], [1], [0, 0, 1, 1], [], []>} : vector<128x2xbf16>, vector<2x128xbf16>, vector<128x128xf32> -> vector<128x128xf32>
    %72 = arith.truncf %53 : vector<128x128xf32> to vector<128x128xbf16>
    %c0_36 = arith.constant 0 : index
    %c0_37 = arith.constant 0 : index
    %73 = vector.load %arg6[%c0_36, %c0_37] : memref<128x128xbf16, #tpu.memory_space<vmem>>, vector<128x128xbf16>
    %74 = tpu.concatenate %72, %73 in 1 : vector<128x128xbf16>, vector<128x128xbf16> -> vector<128x256xbf16>
    %c640 = arith.constant 640 : index
    %c0_38 = arith.constant 0 : index
    %75 = vector.load %arg7[%c640, %c0_38] : memref<1280x128xbf16, #tpu.memory_space<vmem>>, vector<256x128xbf16>
    %cst_39 = arith.constant dense<0.000000e+00> : vector<128x128xf32>
    %76 = tpu.matmul %74, %75, %cst_39 {dimension_numbers = #tpu.dot_dimension_numbers<[1], [0], [0], [1], [0, 0, 1, 1], [], []>} : vector<128x256xbf16>, vector<256x128xbf16>, vector<128x128xf32> -> vector<128x128xf32>
    %77 = arith.addf %76, %71 : vector<128x128xf32>
    %78 = vector.broadcast %8 : vector<1x128xf32> to vector<128x128xf32>
    %79 = arith.addf %77, %78 : vector<128x128xf32>
    %cst_40 = arith.constant 0.000000e+00 : f32
    %80 = vector.broadcast %cst_40 : f32 to vector<128x128xf32>
    %81 = arith.maximumf %79, %80 : vector<128x128xf32>
    %82 = arith.truncf %81 : vector<128x128xf32> to vector<128x128xbf16>
    %c1152 = arith.constant 1152 : index
    %c0_41 = arith.constant 0 : index
    %83 = vector.load %arg7[%c1152, %c0_41] : memref<1280x128xbf16, #tpu.memory_space<vmem>>, vector<128x128xbf16>
    %cst_42 = arith.constant dense<0.000000e+00> : vector<128x128xf32>
    %84 = tpu.matmul %82, %83, %cst_42 {dimension_numbers = #tpu.dot_dimension_numbers<[1], [0], [0], [1], [0, 0, 1, 1], [], []>} : vector<128x128xbf16>, vector<128x128xbf16>, vector<128x128xf32> -> vector<128x128xf32>
    %85 = vector.broadcast %9 : vector<1x128xf32> to vector<128x128xf32>
    %86 = arith.addf %84, %85 : vector<128x128xf32>
    %c0_43 = arith.constant 0 : index
    %c0_44 = arith.constant 0 : index
    %87 = vector.load %arg9[%c0_43, %c0_44] : memref<128x128xf32, #tpu.memory_space<vmem>>, vector<128x128xf32>
    tpu.vector_store %arg9[%c0_43, %c0_44], %86 {strides = array<i32>} : memref<128x128xf32, #tpu.memory_space<vmem>>, vector<128x128xf32>,
    return
  }
}

</mosaic_0001>

<bundles_post_ra>
// kernel: tpu_custom_call.1
= control target key start
LH: loop header
LB: loop body
LE: loop exit
PB: predicated region body
PF: predicated region fallthrough
CT: control target
= control target key end

     0   :  { %14 = vsyncpa [#allocation3], 0  ;;  %s4064_s0 = inlined_call_operand.vmem [shape: bf16[128,128], index: 0, kind: input, shape index: {}]   ;;  %s4065_s1 = inlined_call_operand.hbm [shape: bf16[128,128], index: 1, kind: input, shape index: {}]   ;;  %s4066_s2 = inlined_call_operand.vmem [shape: bf16[2,128], index: 2, kind: input, shape index: {}]   ;;  %s4067_s3 = inlined_call_operand.hbm [shape: bf16[128,128], index: 3, kind: input, shape index: {}]   ;;  %s4068_s4 = inlined_call_operand.hbm [shape: bf16[128,128], index: 4, kind: input, shape index: {}]   ;;  %s4069_s5 = inlined_call_operand.vmem [shape: bf16[128,2], index: 5, kind: input, shape index: {}]   ;;  %s4070_s6 = inlined_call_operand.hbm [shape: bf16[128,128], index: 6, kind: input, shape index: {}]   ;;  %s4071_s7 = inlined_call_operand.hbm [shape: bf16[1280,128], index: 7, kind: input, shape index: {}]   ;;  %s4072_s8 = inlined_call_operand.hbm [shape: f32[13,128], index: 8, kind: input, shape index: {}]   ;;  %s4073_s9 = inlined_call_operand.hbm [shape: f32[128,128], index: 9, kind: output, shape index: {}]  }
   0x1   :  { %15 = vsyncpa [#allocation6], 0 }
   0x2   :  { %16 = vsyncpa [#allocation9], 0 }
   0x3   :  { %17 = vsyncpa [#allocation12], 0 }
   0x4   :  { %18 = vsyncpa [#allocation4], 0  ;;  %s3642_s30 = smov [#allocation5]   ;;  %s3643_s11 = smov [#allocation8]  }
   0x5   :  { %s40_s10 = sshll.u32 %s3642_s30, 4  ;;  %s66_s12 = sshll.u32 %s3643_s11, 4  ;;  %s41_s10 = int_to_ptr.vmem [resolvable:$true] %s40_s10  ;;  %s67_s12 = int_to_ptr.vmem [resolvable:$true] %s66_s12 }
   0x6   :  { %s3500_s13 = scalar_lea.vmem %s41_s10, 1024  ;;  %p3505_p1 = scmp.lt.s32.totalorder %s41_s10, %s41_s10 }
   0x7   :  { %p3501_p0 = scmp.ne.s32.totalorder %s41_s10, %s3500_s13  ;;  %p3506_p2 = scmp.lt.s32.totalorder %s3500_s13, %s3500_s13 }
   0x9   :  { %p3507_p3 = por %p3506_p2, %p3505_p1 }
   0xb   :  { %p3508_p4 = pnand %p3507_p3, %p3501_p0 }
   0xd   :  { %3511 = shalt.err (!%p3508_p4)
}
   0xe   :  { %s3644_s14 = smov 64   ;;  %s3645_s15 = smov 4  }
   0xf   :  { %46 = dma.hbm_to_vmem [thread:$0]  %s4067_s3, 1024, %s41_s10, [#allocation6], %s3644_s14, %s3644_s14, %s3645_s15  }
  0x10   :  { %s3520_s18 = scalar_lea.vmem %s67_s12, 1024  ;;  %p3525_p6 = scmp.lt.s32.totalorder %s67_s12, %s67_s12 }
  0x11   :  { %p3521_p5 = scmp.ne.s32.totalorder %s67_s12, %s3520_s18  ;;  %p3526_p7 = scmp.lt.s32.totalorder %s3520_s18, %s3520_s18 }
  0x13   :  { %p3527_p8 = por %p3526_p7, %p3525_p6 }
  0x15   :  { %p3528_p9 = pnand %p3527_p8, %p3521_p5 }
  0x17   :  { %3531 = shalt.err (!%p3528_p9)
}
  0x18   :  { %72 = dma.hbm_to_vmem [thread:$0]  %s4070_s6, 1024, %s67_s12, [#allocation9], %s3644_s14, %s3644_s14, %s3645_s15  }
  0x19   :  { %s3646_s21 = smov [#allocation2]   ;;  %s3647_s23 = smov [#allocation7]  }
  0x1a   :  { %s26_s22 = sshll.u32 %s3646_s21, 4  ;;  %s52_s24 = sshll.u32 %s3647_s23, 4  ;;  %s27_s22 = int_to_ptr.vmem [resolvable:$true] %s26_s22  ;;  %s53_s24 = int_to_ptr.vmem [resolvable:$true] %s52_s24 }
  0x1b   :  { %s3540_s3 = scalar_lea.vmem %s27_s22, 1024  ;;  %p3545_p11 = scmp.lt.s32.totalorder %s27_s22, %s27_s22 }
  0x1c   :  { %p3541_p10 = scmp.ne.s32.totalorder %s27_s22, %s3540_s3  ;;  %p3546_p12 = scmp.lt.s32.totalorder %s3540_s3, %s3540_s3 }
  0x1e   :  { %p3547_p13 = por %p3546_p12, %p3545_p11 }
  0x20   :  { %p3548_p0 = pnand %p3547_p13, %p3541_p10 }
  0x22   :  { %3551 = shalt.err (!%p3548_p0)
}
  0x23   :  { %32 = dma.hbm_to_vmem [thread:$0]  %s4065_s1, 1024, %s27_s22, [#allocation3], %s3644_s14, %s3644_s14, %s3645_s15  }
  0x24   :  { %s3560_s6 = scalar_lea.vmem %s53_s24, 1024  ;;  %p3565_p2 = scmp.lt.s32.totalorder %s53_s24, %s53_s24 }
  0x25   :  { %p3561_p1 = scmp.ne.s32.totalorder %s53_s24, %s3560_s6  ;;  %p3566_p3 = scmp.lt.s32.totalorder %s3560_s6, %s3560_s6 }
  0x27   :  { %p3567_p4 = por %p3566_p3, %p3565_p2 }
  0x29   :  { %p3568_p5 = pnand %p3567_p4, %p3561_p1 }
  0x2b   :  { %3571 = shalt.err (!%p3568_p5)
}
  0x2c   :  { %58 = dma.hbm_to_vmem [thread:$0]  %s4068_s4, 1024, %s53_s24, [#allocation6], %s3644_s14, %s3644_s14, %s3645_s15  }
  0x2d   :  { %s3648_s29 = smov [#allocation10]   ;;  %s3649_s10 = smov [#allocation11]  }
  0x2e   :  { %s78_s30 = sshll.u32 %s3648_s29, 4  ;;  %s90_s11 = sshll.u32 %s3649_s10, 4  ;;  %s79_s30 = int_to_ptr.vmem [resolvable:$true] %s78_s30  ;;  %s91_s11 = int_to_ptr.vmem [resolvable:$true] %s90_s11 }
  0x2f   :  { %s3580_s1 = scalar_lea.vmem %s79_s30, 10240  ;;  %p3585_p7 = scmp.lt.s32.totalorder %s79_s30, %s79_s30 }
  0x30   :  { %p3581_p6 = scmp.ne.s32.totalorder %s79_s30, %s3580_s1  ;;  %p3586_p8 = scmp.lt.s32.totalorder %s3580_s1, %s3580_s1 }
  0x32   :  { %p3587_p9 = por %p3586_p8, %p3585_p7 }
  0x34   :  { %p3588_p10 = pnand %p3587_p9, %p3581_p6 }
  0x36   :  { %3591 = shalt.err (!%p3588_p10)
}
  0x37   :  { %84 = dma.hbm_to_vmem [thread:$0]  %s4071_s7, 10240, %s79_s30, [#allocation9], %s3644_s14, %s3644_s14, %s3645_s15  }
  0x38   :  { %s3600_s4 = scalar_lea.vmem %s91_s11, 256  ;;  %p3605_p12 = scmp.lt.s32.totalorder %s91_s11, %s91_s11 }
  0x39   :  { %p3601_p11 = scmp.ne.s32.totalorder %s91_s11, %s3600_s4  ;;  %p3606_p13 = scmp.lt.s32.totalorder %s3600_s4, %s3600_s4 }
  0x3b   :  { %p3607_p0 = por %p3606_p13, %p3605_p12 }
  0x3d   :  { %p3608_p1 = pnand %p3607_p0, %p3601_p11 }
  0x3f   :  { %3611 = shalt.err (!%p3608_p1)
}
  0x40   :  { %s3650_s16 = smov 128   ;;  %s3651_s17 = smov 8  }
  0x41   :  { %96 = dma.hbm_to_vmem [thread:$0]  %s4072_s8, 256, %s91_s11, [#allocation12], %s3650_s16, %s3650_s16, %s3651_s17  }
  0x42   :  { %3632 = dma.done.wait [#allocation3], 1024  }
  0x43   :  { %3633 = vsyncadd [#allocation3], 4294966272 }
  0x44   :  { %3634 = dma.done.wait [#allocation6], 2048  }
  0x45   :  { %3635 = vsyncadd [#allocation6], 4294965248 }
  0x46   :  { %3636 = dma.done.wait [#allocation9], 11264  }
  0x47   :  { %3637 = vsyncadd [#allocation9], 4294956032 }
  0x48   :  { %3638 = dma.done.wait [#allocation12], 256  }
  0x49   :  { %3639 = vsyncadd [#allocation12], 4294967040  ;;  %v3363_v0 = vld [vmem:[#allocation10 + $0x38] sm:$0xff]   ;;  %v3364_v1 = vld [vmem:[#allocation10 + $0x30] sm:$0xff]   ;;  %v383_v56 = vlaneseq  ;;  %vm3653_vm0 = vmmov 0   ;;  %vm1942_vm1 = vcmask 15360  }
  0x4a   :  { %3003 = vmatprep.subr.bf16.mxu0 %v3363_v0  ;;  %v3365_v2 = vld [vmem:[#allocation10 + $0x28] sm:$0xff]   ;;  %v3366_v3 = vld [vmem:[#allocation10 + $0x20] sm:$0xff]   ;;  %v3367_v5 = vld [vmem:[#allocation10 + $0x18] sm:$0xff]   ;;  %vm1967_vm2 = vcmask 1040384  }
  0x4b   :  { %3004 = vmatpush3.bf16.msra.mxu0 %v3363_v0  ;;  %v3371_v4 = vld [vmem:[#allocation2] sm:$0xff]   ;;  %v3368_v6 = vld [vmem:[#allocation10 + $0x10] sm:$0xff]   ;;  %v3369_v7 = vld [vmem:[#allocation10 + $0x8] sm:$0xff]   ;;  %v3790_v57 = vshrl.u32 %v383_v56, 7 }
  0x4c   :  { %3005 = vmatprep.subr.bf16.mxu0 %v3364_v1  ;;  %3019 = vmatprep.mubr.bf16.mxu0 %v3371_v4  ;;  %v3370_v8 = vld [vmem:[#allocation10] sm:$0xff]   ;;  %v3372_v9 = vld [vmem:[#allocation2 + $0x8] sm:$0xff]   ;;  %v3373_v10 = vld [vmem:[#allocation2 + $0x10] sm:$0xff]  }
  0x4d   :  { %v3374_v11 = vld [vmem:[#allocation2 + $0x18] sm:$0xff]   ;;  %v3375_v12 = vld [vmem:[#allocation2 + $0x20] sm:$0xff]   ;;  %v3376_v13 = vld [vmem:[#allocation2 + $0x28] sm:$0xff]   ;;  %v385_v58 = vsub.s32 3, %v3790_v57 }
  0x4e   :  { %v3377_v14 = vld [vmem:[#allocation2 + $0x30] sm:$0xff]   ;;  %v3378_v15 = vld [vmem:[#allocation2 + $0x38] sm:$0xff]   ;;  %v3744_v16 = vld [vmem:[%s4064_s0] sm:$0xff]  }
  0x4f   :  { %3006 = vmatpush3.bf16.msra.mxu0 %v3364_v1  ;;  %3051 = vmatprep.mubr.bf16.mxu1 %v3744_v16  ;;  %v3387_v17 = vld [vmem:[#allocation10 + $0x78] sm:$0xff]   ;;  %v3388_v18 = vld [vmem:[#allocation10 + $0x70] sm:$0xff]   ;;  %v3389_v19 = vld [vmem:[#allocation10 + $0x68] sm:$0xff]  }
  0x50   :  { %3007 = vmatprep.subr.bf16.mxu0 %v3365_v2  ;;  %v3390_v20 = vld [vmem:[#allocation10 + $0x60] sm:$0xff]   ;;  %v3391_v21 = vld [vmem:[#allocation10 + $0x58] sm:$0xff]   ;;  %v3750_v46 = vld [vmem:[%s4064_s0 + $0x8] sm:$0xff]  }
  0x51   :  { %v3755_v47 = vld [vmem:[%s4064_s0 + $0x10] sm:$0xff]   ;;  %v3762_v48 = vld [vmem:[%s4064_s0 + $0x18] sm:$0xff]   ;;  %v3767_v49 = vld [vmem:[%s4064_s0 + $0x20] sm:$0xff]  }
  0x52   :  { %v3774_v50 = vld [vmem:[%s4064_s0 + $0x28] sm:$0xff]   ;;  %v3779_v51 = vld [vmem:[%s4064_s0 + $0x30] sm:$0xff]   ;;  %v3786_v52 = vld [vmem:[%s4064_s0 + $0x38] sm:$0xff]  }
  0x53   :  { %3008 = vmatpush3.bf16.msra.mxu0 %v3365_v2  ;;  %v3392_v53 = vld [vmem:[#allocation10 + $0x50] sm:$0xff]   ;;  %v3393_v54 = vld [vmem:[#allocation10 + $0x48] sm:$0xff]   ;;  %v3394_v55 = vld [vmem:[#allocation10 + $0x40] sm:$0xff]  }
  0x54   :  { %3009 = vmatprep.subr.bf16.mxu0 %v3366_v3  ;;  %v3793_v59 = vld [vmem:[#allocation11] sm:$0xff] }
  0x55   :  { %v386_v61 = vrot.slane %v3793_v59, %v385_v58 }
  0x57   :  { %3010 = vmatpush3.bf16.msra.mxu0 %v3366_v3 }
  0x58   :  { %3011 = vmatprep.subr.bf16.mxu0 %v3367_v5 }
  0x5b   :  { %3012 = vmatpush3.bf16.msra.mxu0 %v3367_v5 }
  0x5c   :  { %3013 = vmatprep.subr.bf16.mxu0 %v3368_v6 }
  0x5f   :  { %3014 = vmatpush3.bf16.msra.mxu0 %v3368_v6 }
  0x60   :  { %3015 = vmatprep.subr.bf16.mxu0 %v3369_v7 }
  0x63   :  { %3016 = vmatpush3.bf16.msra.mxu0 %v3369_v7 }
  0x64   :  { %3017 = vmatprep.subr.bf16.mxu0 %v3370_v8 }
  0x67   :  { %3018 = vmatpush3.bf16.msra.mxu0 %v3370_v8 }
  0x68   :  { %3067 = vmatprep.subr.bf16.mxu0 %v3387_v17 }
  0x6a   :  { %3020 = vmatmul.mubr.bf16.vlgmr.msra.gmra.mxu0 %v3372_v9 }
  0x6b   :  { %3023 = vmatprep.mubr.bf16.mxu0 %v3373_v10  ;;  %3068 = vmatpush3.bf16.msra.mxu0 %v3387_v17 }
  0x6c   :  { %3069 = vmatprep.subr.bf16.mxu0 %v3388_v18 }
  0x6f   :  { %3070 = vmatpush3.bf16.msra.mxu0 %v3388_v18 }
  0x70   :  { %3071 = vmatprep.subr.bf16.mxu0 %v3389_v19 }
  0x72   :  { %3024 = vmatmul.mubr.bf16.gmra.mxu0 %v3374_v11 }
  0x73   :  { %3027 = vmatprep.mubr.bf16.mxu0 %v3375_v12  ;;  %3072 = vmatpush3.bf16.msra.mxu0 %v3389_v19 }
  0x74   :  { %3073 = vmatprep.subr.bf16.mxu0 %v3390_v20 }
  0x77   :  { %3074 = vmatpush3.bf16.msra.mxu0 %v3390_v20 }
  0x78   :  { %3075 = vmatprep.subr.bf16.mxu0 %v3391_v21 }
  0x7a   :  { %3028 = vmatmul.mubr.bf16.gmra.mxu0 %v3376_v13 }
  0x7b   :  { %3031 = vmatprep.mubr.bf16.mxu0 %v3377_v14  ;;  %3076 = vmatpush3.bf16.msra.mxu0 %v3391_v21 }
  0x7c   :  { %3077 = vmatprep.subr.bf16.mxu0 %v3392_v53 }
  0x7f   :  { %3078 = vmatpush3.bf16.msra.mxu0 %v3392_v53 }
  0x80   :  { %3079 = vmatprep.subr.bf16.mxu0 %v3393_v54 }
  0x82   :  { %3032 = vmatmul.mubr.bf16.gmra.mxu0 %v3378_v15 }
  0x83   :  { %3080 = vmatpush3.bf16.msra.mxu0 %v3393_v54 }
  0x84   :  { %3081 = vmatprep.subr.bf16.mxu0 %v3394_v55 }
  0x87   :  { %3082 = vmatpush3.bf16.msra.mxu0 %v3394_v55 }
 0x12a   :  { %v3021_v22 = vpop.f32.mrf.mxu0 }
 0x12c   :  { %v312_v23 = vpop.f32.mrf.mxu0 }
 0x12e   :  { %v3022_v24 = vpop.f32.mrf.mxu0 }
 0x12f   :  { %v376_v44 = vpack.c.bf16 %v3022_v24, %v3021_v22 }
 0x130   :  { %v315_v25 = vpop.f32.mrf.mxu0 }
 0x131   :  { %v375_v45 = vpack.c.bf16 %v315_v25, %v312_v23 }
 0x132   :  { %v3025_v26 = vpop.f32.mrf.mxu0 }
 0x134   :  { %v328_v27 = vpop.f32.mrf.mxu0 }
 0x136   :  { %v3026_v28 = vpop.f32.mrf.mxu0 }
 0x137   :  { %v378_v42 = vpack.c.bf16 %v3026_v28, %v3025_v26 }
 0x138   :  { %v331_v29 = vpop.f32.mrf.mxu0 }
 0x139   :  { %v377_v43 = vpack.c.bf16 %v331_v29, %v328_v27 }
 0x13a   :  { %v3029_v30 = vpop.f32.mrf.mxu0 }
 0x13c   :  { %v344_v31 = vpop.f32.mrf.mxu0 }
 0x13e   :  { %v3030_v32 = vpop.f32.mrf.mxu0 }
 0x13f   :  { %v380_v40 = vpack.c.bf16 %v3030_v32, %v3029_v30 }
 0x140   :  { %v347_v33 = vpop.f32.mrf.mxu0 }
 0x141   :  { %v379_v41 = vpack.c.bf16 %v347_v33, %v344_v31 }
 0x142   :  { %v3033_v34 = vpop.f32.mrf.mxu0 }
 0x144   :  { %v360_v35 = vpop.f32.mrf.mxu0 }
 0x146   :  { %v3034_v36 = vpop.f32.mrf.mxu0 }
 0x147   :  { %v382_v37 = vpack.c.bf16 %v3034_v36, %v3033_v34 }
 0x148   :  { %v363_v38 = vpop.f32.mrf.mxu0 }
 0x149   :  { %v381_v39 = vpack.c.bf16 %v363_v38, %v360_v35  ;;  %3035 = vmatprep.subr.bf16.mxu1 %v382_v37 }
 0x14a   :  { %3036 = vmatpush3.bf16.msra.mxu1 %v382_v37 }
 0x14b   :  { %3037 = vmatprep.subr.bf16.mxu1 %v381_v39 }
 0x14e   :  { %3038 = vmatpush3.bf16.msra.mxu1 %v381_v39 }
 0x14f   :  { %3039 = vmatprep.subr.bf16.mxu1 %v380_v40 }
 0x152   :  { %3040 = vmatpush3.bf16.msra.mxu1 %v380_v40 }
 0x153   :  { %3041 = vmatprep.subr.bf16.mxu1 %v379_v41 }
 0x156   :  { %3042 = vmatpush3.bf16.msra.mxu1 %v379_v41 }
 0x157   :  { %3043 = vmatprep.subr.bf16.mxu1 %v378_v42 }
 0x15a   :  { %3044 = vmatpush3.bf16.msra.mxu1 %v378_v42 }
 0x15b   :  { %3045 = vmatprep.subr.bf16.mxu1 %v377_v43 }
 0x15e   :  { %3046 = vmatpush3.bf16.msra.mxu1 %v377_v43 }
 0x15f   :  { %3047 = vmatprep.subr.bf16.mxu1 %v376_v44 }
 0x162   :  { %3048 = vmatpush3.bf16.msra.mxu1 %v376_v44 }
 0x163   :  { %3049 = vmatprep.subr.bf16.mxu1 %v375_v45 }
 0x166   :  { %3050 = vmatpush3.bf16.msra.mxu1 %v375_v45 }
 0x169   :  { %3052 = vmatmul.mubr.bf16.vlgmr.msra.gmra.mxu1 %v3750_v46 }
 0x16a   :  { %3055 = vmatprep.mubr.bf16.mxu1 %v3755_v47 }
 0x171   :  { %3056 = vmatmul.mubr.bf16.gmra.mxu1 %v3762_v48 }
 0x172   :  { %3059 = vmatprep.mubr.bf16.mxu1 %v3767_v49 }
 0x179   :  { %3060 = vmatmul.mubr.bf16.gmra.mxu1 %v3774_v50 }
 0x17a   :  { %3063 = vmatprep.mubr.bf16.mxu1 %v3779_v51 }
 0x181   :  { %3064 = vmatmul.mubr.bf16.gmra.mxu1 %v3786_v52 }
 0x182   :  { %3115 = vmatprep.mubr.bf16.mxu1 %v3744_v16 }
 0x229   :  { %v3053_v60 = vpop.f32.mrf.mxu1 }
 0x22a   :  { %v478_v2 = vadd.f32 %v3053_v60, %v386_v61 }
 0x22b   :  { %v469_v62 = vpop.f32.mrf.mxu1 }
 0x22c   :  { %v470_v0 = vadd.f32 %v469_v62, %v386_v61  ;;  %v534_v9 = vmax.f32 %v478_v2, 0.0 }
 0x22d   :  { %v3054_v63 = vpop.f32.mrf.mxu1 }
 0x22e   :  { %v481_v1 = vadd.f32 %v3054_v63, %v386_v61  ;;  %v532_v7 = vmax.f32 %v470_v0, 0.0 }
 0x22f   :  { %v472_v3 = vpop.f32.mrf.mxu1 }
 0x230   :  { %v473_v4 = vadd.f32 %v472_v3, %v386_v61  ;;  %v535_v5 = vmax.f32 %v481_v1, 0.0 }
 0x231   :  { %v3057_v6 = vpop.f32.mrf.mxu1 }
 0x232   :  { %v533_v8 = vmax.f32 %v473_v4, 0.0  ;;  %v549_v12 = vpack.c.bf16 %v535_v5, %v534_v9  ;;  %v494_v16 = vadd.f32 %v3057_v6, %v386_v61 }
 0x233   :  { %v485_v10 = vpop.f32.mrf.mxu1 }
 0x234   :  { %v548_v11 = vpack.c.bf16 %v533_v8, %v532_v7  ;;  %v486_v14 = vadd.f32 %v485_v10, %v386_v61  ;;  %v538_v23 = vmax.f32 %v494_v16, 0.0 }
 0x235   :  { %v3058_v13 = vpop.f32.mrf.mxu1 }
 0x236   :  { %v497_v15 = vadd.f32 %v3058_v13, %v386_v61  ;;  %3083 = vmatprep.mubr.bf16.mxu0 %v548_v11  ;;  %v536_v21 = vmax.f32 %v486_v14, 0.0 }
 0x237   :  { %v488_v17 = vpop.f32.mrf.mxu1  ;;  %3084 = vmatmul.mubr.bf16.vlgmr.msra.gmra.mxu0 %v549_v12 }
 0x238   :  { %v489_v18 = vadd.f32 %v488_v17, %v386_v61  ;;  %v539_v19 = vmax.f32 %v497_v15, 0.0 }
 0x239   :  { %v3061_v20 = vpop.f32.mrf.mxu1 }
 0x23a   :  { %v537_v22 = vmax.f32 %v489_v18, 0.0  ;;  %v551_v26 = vpack.c.bf16 %v539_v19, %v538_v23  ;;  %v510_v30 = vadd.f32 %v3061_v20, %v386_v61  ;;  %v3396_v23 = vld [vmem:[#allocation10 + $0xb0] sm:$0xff]  }
 0x23b   :  { %v501_v24 = vpop.f32.mrf.mxu1 }
 0x23c   :  { %v550_v25 = vpack.c.bf16 %v537_v22, %v536_v21  ;;  %v502_v28 = vadd.f32 %v501_v24, %v386_v61  ;;  %v542_v37 = vmax.f32 %v510_v30, 0.0  ;;  %v3395_v22 = vld [vmem:[#allocation10 + $0xb8] sm:$0xff]   ;;  %v3397_v24 = vld [vmem:[#allocation10 + $0xa8] sm:$0xff]   ;;  %v3409_v30 = vld [vmem:[#allocation7 + $0x30] sm:$0xff]  }
 0x23d   :  { %v3062_v27 = vpop.f32.mrf.mxu1 }
 0x23e   :  { %v513_v29 = vadd.f32 %v3062_v27, %v386_v61  ;;  %3087 = vmatprep.mubr.bf16.mxu0 %v550_v25  ;;  %v540_v35 = vmax.f32 %v502_v28, 0.0  ;;  %v3398_v25 = vld [vmem:[#allocation10 + $0xa0] sm:$0xff]   ;;  %v3400_v27 = vld [vmem:[#allocation10 + $0x90] sm:$0xff]  }
 0x23f   :  { %v504_v31 = vpop.f32.mrf.mxu1  ;;  %3088 = vmatmul.mubr.bf16.gmra.mxu0 %v551_v26  ;;  %v3399_v26 = vld [vmem:[#allocation10 + $0x98] sm:$0xff]   ;;  %v3402_v28 = vld [vmem:[#allocation10 + $0x80] sm:$0xff]  }
 0x240   :  { %v505_v32 = vadd.f32 %v504_v31, %v386_v61  ;;  %v543_v33 = vmax.f32 %v513_v29, 0.0  ;;  %v3407_v29 = vld [vmem:[#allocation7 + $0x20] sm:$0xff]   ;;  %v3410_v31 = vld [vmem:[#allocation7 + $0x38] sm:$0xff]  }
 0x241   :  { %v3065_v34 = vpop.f32.mrf.mxu1 }
 0x242   :  { %v541_v36 = vmax.f32 %v505_v32, 0.0  ;;  %v553_v40 = vpack.c.bf16 %v543_v33, %v542_v37  ;;  %v526_v44 = vadd.f32 %v3065_v34, %v386_v61  ;;  %v3652_v32 = vmov 0.0  }
 0x243   :  { %v517_v38 = vpop.f32.mrf.mxu1  ;;  %3131 = vmatprep.subr.bf16.mxu0 %v3652_v32 }
 0x244   :  { %v552_v39 = vpack.c.bf16 %v541_v36, %v540_v35  ;;  %v518_v42 = vadd.f32 %v517_v38, %v386_v61  ;;  %v546_v58 = vmax.f32 %v526_v44, 0.0 }
 0x245   :  { %v3066_v41 = vpop.f32.mrf.mxu1 }
 0x246   :  { %v529_v43 = vadd.f32 %v3066_v41, %v386_v61  ;;  %3091 = vmatprep.mubr.bf16.mxu0 %v552_v39  ;;  %v544_v55 = vmax.f32 %v518_v42, 0.0 }
 0x247   :  { %v520_v45 = vpop.f32.mrf.mxu1  ;;  %3092 = vmatmul.mubr.bf16.gmra.mxu0 %v553_v40 }
 0x248   :  { %v521_v53 = vadd.f32 %v520_v45, %v386_v61  ;;  %v547_v54 = vmax.f32 %v529_v43, 0.0  ;;  %v711_v43 = vsub.s32 4, %v3790_v57 }
 0x24a   :  { %v545_v56 = vmax.f32 %v521_v53, 0.0  ;;  %v555_v62 = vpack.c.bf16 %v547_v54, %v546_v58  ;;  %v712_v53 = vrot.slane %v3793_v59, %v711_v43 }
 0x24c   :  { %v554_v60 = vpack.c.bf16 %v545_v56, %v544_v55 }
 0x24e   :  { %3095 = vmatprep.mubr.bf16.mxu0 %v554_v60 }
 0x24f   :  { %3096 = vmatmul.mubr.bf16.gmra.mxu0 %v555_v62 }
 0x250   :  { %3147 = vmatprep.mubr.msk.bf16.mxu0 %vm3653_vm0, %v3652_v32 }
 0x2f7   :  { %v3085_v63 = vpop.f32.mrf.mxu0 }
 0x2f9   :  { %v638_v0 = vpop.f32.mrf.mxu0 }
 0x2fb   :  { %v3086_v1 = vpop.f32.mrf.mxu0 }
 0x2fc   :  { %v702_v20 = vpack.c.bf16 %v3086_v1, %v3085_v63 }
 0x2fd   :  { %v641_v2 = vpop.f32.mrf.mxu0 }
 0x2fe   :  { %v701_v21 = vpack.c.bf16 %v641_v2, %v638_v0 }
 0x2ff   :  { %v3089_v3 = vpop.f32.mrf.mxu0 }
 0x301   :  { %v654_v4 = vpop.f32.mrf.mxu0 }
 0x303   :  { %v3090_v5 = vpop.f32.mrf.mxu0 }
 0x304   :  { %v704_v18 = vpack.c.bf16 %v3090_v5, %v3089_v3 }
 0x305   :  { %v657_v6 = vpop.f32.mrf.mxu0 }
 0x306   :  { %v703_v19 = vpack.c.bf16 %v657_v6, %v654_v4 }
 0x307   :  { %v3093_v7 = vpop.f32.mrf.mxu0 }
 0x309   :  { %v670_v8 = vpop.f32.mrf.mxu0 }
 0x30b   :  { %v3094_v9 = vpop.f32.mrf.mxu0 }
 0x30c   :  { %v706_v16 = vpack.c.bf16 %v3094_v9, %v3093_v7 }
 0x30d   :  { %v673_v61 = vpop.f32.mrf.mxu0 }
 0x30e   :  { %v705_v17 = vpack.c.bf16 %v673_v61, %v670_v8 }
 0x30f   :  { %v3097_v10 = vpop.f32.mrf.mxu0 }
 0x311   :  { %v686_v11 = vpop.f32.mrf.mxu0 }
 0x313   :  { %v3098_v12 = vpop.f32.mrf.mxu0 }
 0x314   :  { %v708_v13 = vpack.c.bf16 %v3098_v12, %v3097_v10 }
 0x315   :  { %v689_v14 = vpop.f32.mrf.mxu0 }
 0x316   :  { %v707_v15 = vpack.c.bf16 %v689_v14, %v686_v11  ;;  %3099 = vmatprep.subr.bf16.mxu1 %v708_v13 }
 0x317   :  { %3100 = vmatpush3.bf16.msra.mxu1 %v708_v13 }
 0x318   :  { %3101 = vmatprep.subr.bf16.mxu1 %v707_v15 }
 0x31b   :  { %3102 = vmatpush3.bf16.msra.mxu1 %v707_v15 }
 0x31c   :  { %3103 = vmatprep.subr.bf16.mxu1 %v706_v16 }
 0x31f   :  { %3104 = vmatpush3.bf16.msra.mxu1 %v706_v16 }
 0x320   :  { %3105 = vmatprep.subr.bf16.mxu1 %v705_v17 }
 0x323   :  { %3106 = vmatpush3.bf16.msra.mxu1 %v705_v17 }
 0x324   :  { %3107 = vmatprep.subr.bf16.mxu1 %v704_v18 }
 0x327   :  { %3108 = vmatpush3.bf16.msra.mxu1 %v704_v18 }
 0x328   :  { %3109 = vmatprep.subr.bf16.mxu1 %v703_v19 }
 0x32b   :  { %3110 = vmatpush3.bf16.msra.mxu1 %v703_v19 }
 0x32c   :  { %3111 = vmatprep.subr.bf16.mxu1 %v702_v20 }
 0x32f   :  { %3112 = vmatpush3.bf16.msra.mxu1 %v702_v20 }
 0x330   :  { %3113 = vmatprep.subr.bf16.mxu1 %v701_v21 }
 0x333   :  { %3114 = vmatpush3.bf16.msra.mxu1 %v701_v21 }
 0x334   :  { %3151 = vmatprep.subr.bf16.mxu1 %v3395_v22 }
 0x336   :  { %3116 = vmatmul.mubr.bf16.vlgmr.msra.gmra.mxu1 %v3750_v46  ;;  %v3401_v46 = vld [vmem:[#allocation10 + $0x88] sm:$0xff]  }
 0x337   :  { %3152 = vmatpush3.bf16.msra.mxu1 %v3395_v22  ;;  %3119 = vmatprep.mubr.bf16.mxu1 %v3755_v47  ;;  %v3403_v47 = vld [vmem:[#allocation7] sm:$0xff]  }
 0x338   :  { %3153 = vmatprep.subr.bf16.mxu1 %v3396_v23 }
 0x33b   :  { %3154 = vmatpush3.bf16.msra.mxu1 %v3396_v23 }
 0x33c   :  { %3155 = vmatprep.subr.bf16.mxu1 %v3397_v24 }
 0x33e   :  { %3120 = vmatmul.mubr.bf16.gmra.mxu1 %v3762_v48  ;;  %v3404_v48 = vld [vmem:[#allocation7 + $0x8] sm:$0xff]  }
 0x33f   :  { %3156 = vmatpush3.bf16.msra.mxu1 %v3397_v24  ;;  %3123 = vmatprep.mubr.bf16.mxu1 %v3767_v49  ;;  %v3405_v49 = vld [vmem:[#allocation7 + $0x10] sm:$0xff]  }
 0x340   :  { %3157 = vmatprep.subr.bf16.mxu1 %v3398_v25 }
 0x343   :  { %3158 = vmatpush3.bf16.msra.mxu1 %v3398_v25 }
 0x344   :  { %3159 = vmatprep.subr.bf16.mxu1 %v3399_v26 }
 0x346   :  { %3124 = vmatmul.mubr.bf16.gmra.mxu1 %v3774_v50  ;;  %v3406_v50 = vld [vmem:[#allocation7 + $0x18] sm:$0xff]  }
 0x347   :  { %3160 = vmatpush3.bf16.msra.mxu1 %v3399_v26  ;;  %3127 = vmatprep.mubr.bf16.mxu1 %v3779_v51  ;;  %v3408_v51 = vld [vmem:[#allocation7 + $0x28] sm:$0xff]  }
 0x348   :  { %3161 = vmatprep.subr.bf16.mxu1 %v3400_v27 }
 0x34b   :  { %3162 = vmatpush3.bf16.msra.mxu1 %v3400_v27 }
 0x34c   :  { %3163 = vmatprep.subr.bf16.mxu1 %v3401_v46 }
 0x34e   :  { %3128 = vmatmul.mubr.bf16.gmra.mxu1 %v3786_v52 }
 0x34f   :  { %3164 = vmatpush3.bf16.msra.mxu1 %v3401_v46  ;;  %3167 = vmatprep.mubr.bf16.mxu1 %v3403_v47 }
 0x350   :  { %3165 = vmatprep.subr.bf16.mxu1 %v3402_v28 }
 0x353   :  { %3166 = vmatpush3.bf16.msra.mxu1 %v3402_v28 }
 0x356   :  { %3168 = vmatmul.mubr.bf16.vlgmr.msra.gmra.mxu1 %v3404_v48 }
 0x357   :  { %3171 = vmatprep.mubr.bf16.mxu1 %v3405_v49 }
 0x35e   :  { %3172 = vmatmul.mubr.bf16.gmra.mxu1 %v3406_v50 }
 0x35f   :  { %3175 = vmatprep.mubr.bf16.mxu1 %v3407_v29 }
 0x366   :  { %3176 = vmatmul.mubr.bf16.gmra.mxu1 %v3408_v51 }
 0x367   :  { %3179 = vmatprep.mubr.bf16.mxu1 %v3409_v30 }
 0x36e   :  { %3180 = vmatmul.mubr.bf16.gmra.mxu1 %v3410_v31 }
 0x3f6   :  { %v3806_v52 = vpop.f32.mrf.mxu1 }
 0x3f7   :  { %v756_v29 = vadd.f32 %v3806_v52, %v712_v53 }
 0x3f8   :  { %v3808_v33 = vpop.f32.mrf.mxu1 }
 0x3fa   :  { %v3118_v34 = vpop.f32.mrf.mxu1 }
 0x3fb   :  { %v759_v28 = vadd.f32 %v3118_v34, %v712_v53 }
 0x3fc   :  { %v3810_v35 = vpop.f32.mrf.mxu1 }
 0x3fd   :  { %v813_v31 = vmax.f32 %v759_v28, 0.0 }
 0x3fe   :  { %v3121_v36 = vpop.f32.mrf.mxu1 }
 0x3ff   :  { %v772_v20 = vadd.f32 %v3121_v36, %v712_v53  ;;  %v751_v36 = vadd.f32 %v3810_v35, %v712_v53 }
 0x400   :  { %v763_v37 = vpop.f32.mrf.mxu1 }
 0x401   :  { %v816_v27 = vmax.f32 %v772_v20, 0.0  ;;  %v764_v46 = vadd.f32 %v763_v37, %v712_v53 }
 0x402   :  { %v3122_v38 = vpop.f32.mrf.mxu1 }
 0x403   :  { %v775_v16 = vadd.f32 %v3122_v38, %v712_v53  ;;  %v814_v51 = vmax.f32 %v764_v46, 0.0 }
 0x404   :  { %v766_v39 = vpop.f32.mrf.mxu1 }
 0x405   :  { %v817_v23 = vmax.f32 %v775_v16, 0.0  ;;  %v767_v24 = vadd.f32 %v766_v39, %v712_v53  ;;  %v812_v39 = vmax.f32 %v756_v29, 0.0  ;;  %v3425_v16 = vld [vmem:[#allocation10 + $0xc8] sm:$0xff]  }
 0x406   :  { %v3125_v40 = vpop.f32.mrf.mxu1 }
 0x407   :  { %v788_v7 = vadd.f32 %v3125_v40, %v712_v53  ;;  %v830_v48 = vpack.c.bf16 %v817_v23, %v816_v27  ;;  %v815_v49 = vmax.f32 %v767_v24, 0.0  ;;  %v748_v40 = vadd.f32 %v3808_v33, %v712_v53  ;;  %v826_v33 = vld [vmem:[%s4066_s2] sm:$0x1] }
 0x408   :  { %v779_v41 = vpop.f32.mrf.mxu1  ;;  %v1146_v24 = vsub.s32 5, %v3790_v57 }
 0x409   :  { %v820_v13 = vmax.f32 %v788_v7, 0.0  ;;  %v780_v14 = vadd.f32 %v779_v41, %v712_v53  ;;  %v829_v38 = vpack.c.bf16 %v815_v49, %v814_v51  ;;  %v828_v41 = vpack.c.bf16 %v813_v31, %v812_v39  ;;  %v3860_v7 = vld [vmem:[#allocation5 + $0x38] sm:$0xff]  }
 0x40a   :  { %v3126_v42 = vpop.f32.mrf.mxu1  ;;  %v810_v43 = vmax.f32 %v748_v40, 0.0  ;;  %v3427_v39 = vld [vmem:[#allocation10 + $0x138] sm:$0xff]  }
 0x40b   :  { %v791_v3 = vadd.f32 %v3126_v42, %v712_v53  ;;  %v818_v21 = vmax.f32 %v780_v14, 0.0  ;;  %v811_v42 = vmax.f32 %v751_v36, 0.0  ;;  %v3423_v14 = vld [vmem:[#allocation10 + $0xd8] sm:$0xff]  }
 0x40c   :  { %v782_v44 = vpop.f32.mrf.mxu1 }
 0x40d   :  { %v821_v61 = vmax.f32 %v791_v3, 0.0  ;;  %v783_v10 = vadd.f32 %v782_v44, %v712_v53  ;;  %v3844_v3 = vld [vmem:[#allocation5 + $0x10] sm:$0xff]  }
 0x40e   :  { %v3129_v45 = vpop.f32.mrf.mxu1 }
 0x40f   :  { %v804_v55 = vadd.f32 %v3129_v45, %v712_v53  ;;  %v832_v17 = vpack.c.bf16 %v821_v61, %v820_v13  ;;  %v819_v18 = vmax.f32 %v783_v10, 0.0  ;;  %v827_v45 = vpack.c.bf16 %v811_v42, %v810_v43  ;;  %v3419_v10 = vld [vmem:[#allocation10 + $0xf8] sm:$0xff]   ;;  %v3422_v13 = vld [vmem:[#allocation10 + $0xe0] sm:$0xff]  }
 0x410   :  { %v795_v54 = vpop.f32.mrf.mxu1  ;;  %3215 = vmatprep.subr.bf16.mxu1 %v3419_v10  ;;  %v1594_v43 = vsub.s32 1, %v3790_v57 }
 0x411   :  { %v824_v62 = vmax.f32 %v804_v55, 0.0  ;;  %v796_v63 = vadd.f32 %v795_v54, %v712_v53  ;;  %v831_v25 = vpack.c.bf16 %v819_v18, %v818_v21  ;;  %3216 = vmatpush3.bf16.msra.mxu1 %v3419_v10 }
 0x412   :  { %v3130_v56 = vpop.f32.mrf.mxu1 }
 0x413   :  { %v807_v58 = vadd.f32 %v3130_v56, %v712_v53  ;;  %v822_v8 = vmax.f32 %v796_v63, 0.0 }
 0x414   :  { %v798_v60 = vpop.f32.mrf.mxu1 }
 0x415   :  { %v825_v0 = vmax.f32 %v807_v58, 0.0  ;;  %v799_v1 = vadd.f32 %v798_v60, %v712_v53  ;;  %v3411_v53 = vld [vmem:[#allocation5] sm:$0xff]  }
 0x416   :  { %v3814_v2 = vpop.f32.mrf.mxu1 }
 0x417   :  { %v834_v4 = vpack.c.bf16 %v825_v0, %v824_v62  ;;  %v823_v5 = vmax.f32 %v799_v1, 0.0  ;;  %v3842_v1 = vld [vmem:[#allocation5 + $0x8] sm:$0xff]  }
 0x418   :  { %v3816_v6 = vpop.f32.mrf.mxu1 }
 0x419   :  { %3132 = vmatpush3.bf16.msra.mxu0 %v834_v4  ;;  %v833_v11 = vpack.c.bf16 %v823_v5, %v822_v8  ;;  %v3848_v4 = vld [vmem:[#allocation5 + $0x18] sm:$0xff]   ;;  %v3850_v5 = vld [vmem:[#allocation5 + $0x20] sm:$0xff]   ;;  %v1589_v8 = vsub.s32 0, %v3790_v57 }
 0x41a   :  { %v3818_v9 = vpop.f32.mrf.mxu1  ;;  %3133 = vmatprep.subr.bf16.mxu0 %v3652_v32 }
 0x41b   :  { %v1137_v63 = vpack.c.bf16 %v3818_v9, %v3814_v2  ;;  %v3854_v2 = vld [vmem:[#allocation5 + $0x28] sm:$0xff]  }
 0x41c   :  { %v3821_v12 = vpop.f32.mrf.mxu1  ;;  %v3864_v9 = vld [vmem:[#allocation11 + $0x8] sm:$0x1f] }
 0x41d   :  { %3134 = vmatpush3.bf16.msra.mxu0 %v833_v11  ;;  %v1136_v0 = vpack.c.bf16 %v3821_v12, %v3816_v6  ;;  %v3856_v6 = vld [vmem:[#allocation5 + $0x30] sm:$0xff]   ;;  %v3867_v61 = vrot.slane %v3864_v9, %v1589_v8  ;;  %v3421_v12 = vld [vmem:[#allocation10 + $0xe8] sm:$0xff]   ;;  %v876_v18 = vrot.slane %v3864_v9, 3 }
 0x41e   :  { %v3823_v15 = vpop.f32.mrf.mxu1  ;;  %3135 = vmatprep.subr.bf16.mxu0 %v3652_v32  ;;  %v3420_v11 = vld [vmem:[#allocation10 + $0xf0] sm:$0xff]  }
 0x41f   :  { %3217 = vmatprep.subr.bf16.mxu1 %v3420_v11 }
 0x420   :  { %v1089_v19 = vpop.f32.mrf.mxu1  ;;  %3218 = vmatpush3.bf16.msra.mxu1 %v3420_v11 }
 0x421   :  { %3136 = vmatpush3.bf16.msra.mxu0 %v832_v17  ;;  %3219 = vmatprep.subr.bf16.mxu1 %v3421_v12  ;;  %v3426_v17 = vld [vmem:[#allocation10 + $0xc0] sm:$0xff]  }
 0x422   :  { %v3174_v22 = vpop.f32.mrf.mxu1  ;;  %3137 = vmatprep.subr.bf16.mxu0 %v3652_v32 }
 0x423   :  { %v1139_v60 = vpack.c.bf16 %v3174_v22, %v3823_v15  ;;  %v3424_v15 = vld [vmem:[#allocation10 + $0xd0] sm:$0xff]  }
 0x424   :  { %v1092_v26 = vpop.f32.mrf.mxu1  ;;  %3220 = vmatpush3.bf16.msra.mxu1 %v3421_v12 }
 0x425   :  { %3138 = vmatpush3.bf16.msra.mxu0 %v831_v25  ;;  %v1138_v62 = vpack.c.bf16 %v1092_v26, %v1089_v19  ;;  %3221 = vmatprep.subr.bf16.mxu1 %v3422_v13  ;;  %v3875_v26 = vrot.slane %v3793_v59, %v1146_v24 }
 0x426   :  { %v3177_v47 = vpop.f32.mrf.mxu1  ;;  %3139 = vmatprep.subr.bf16.mxu0 %v3652_v32 }
 0x428   :  { %v1105_v50 = vpop.f32.mrf.mxu1  ;;  %3222 = vmatpush3.bf16.msra.mxu1 %v3422_v13 }
 0x429   :  { %3140 = vmatpush3.bf16.msra.mxu0 %v830_v48  ;;  %3223 = vmatprep.subr.bf16.mxu1 %v3423_v14 }
 0x42a   :  { %v3178_v30 = vpop.f32.mrf.mxu1  ;;  %3141 = vmatprep.subr.bf16.mxu0 %v3652_v32 }
 0x42b   :  { %v1141_v56 = vpack.c.bf16 %v3178_v30, %v3177_v47 }
 0x42c   :  { %v1108_v37 = vpop.f32.mrf.mxu1  ;;  %3224 = vmatpush3.bf16.msra.mxu1 %v3423_v14 }
 0x42d   :  { %3142 = vmatpush3.bf16.msra.mxu0 %v829_v38  ;;  %v1140_v58 = vpack.c.bf16 %v1108_v37, %v1105_v50  ;;  %3225 = vmatprep.subr.bf16.mxu1 %v3424_v15 }
 0x42e   :  { %v3181_v34 = vpop.f32.mrf.mxu1  ;;  %3143 = vmatprep.subr.bf16.mxu0 %v3652_v32 }
 0x430   :  { %v1121_v52 = vpop.f32.mrf.mxu1  ;;  %3226 = vmatpush3.bf16.msra.mxu1 %v3424_v15 }
 0x431   :  { %3144 = vmatpush3.bf16.msra.mxu0 %v828_v41  ;;  %3227 = vmatprep.subr.bf16.mxu1 %v3425_v16 }
 0x432   :  { %v3182_v44 = vpop.f32.mrf.mxu1  ;;  %3145 = vmatprep.subr.bf16.mxu0 %v3652_v32 }
 0x433   :  { %v1143_v54 = vpack.c.bf16 %v3182_v44, %v3181_v34 }
 0x434   :  { %v1124_v35 = vpop.f32.mrf.mxu1  ;;  %3228 = vmatpush3.bf16.msra.mxu1 %v3425_v16 }
 0x435   :  { %3146 = vmatpush3.bf16.msra.mxu0 %v827_v45  ;;  %v1142_v55 = vpack.c.bf16 %v1124_v35, %v1121_v52  ;;  %3229 = vmatprep.subr.bf16.mxu1 %v3426_v17  ;;  %v1590_v52 = vrot.slane %v3793_v59, %v1589_v8  ;;  %v3428_v35 = vld [vmem:[#allocation10 + $0x130] sm:$0xff]   ;;  %v3429_v8 = vld [vmem:[#allocation10 + $0x128] sm:$0xff]  }
 0x436   :  { %3183 = vmatprep.subr.bf16.mxu0 %v1143_v54 }
 0x438   :  { %3148 = vmatmul.mubr.bf16.vlgmr.msra.gmra.mxu0 %v826_v33  ;;  %3230 = vmatpush3.bf16.msra.mxu1 %v3426_v17  ;;  %v3430_v17 = vld [vmem:[#allocation10 + $0x120] sm:$0xff]  }
 0x439   :  { %3184 = vmatpush3.bf16.msra.mxu0 %v1143_v54  ;;  %3199 = vmatprep.mubr.bf16.mxu0 %v3411_v53 }
 0x43a   :  { %3185 = vmatprep.subr.bf16.mxu0 %v1142_v55  ;;  %3279 = vmatprep.subr.bf16.mxu1 %v3652_v32 }
 0x43d   :  { %3186 = vmatpush3.bf16.msra.mxu0 %v1142_v55 }
 0x43e   :  { %3187 = vmatprep.subr.bf16.mxu0 %v1141_v56 }
 0x441   :  { %3188 = vmatpush3.bf16.msra.mxu0 %v1141_v56 }
 0x442   :  { %3189 = vmatprep.subr.bf16.mxu0 %v1140_v58 }
 0x445   :  { %3190 = vmatpush3.bf16.msra.mxu0 %v1140_v58  ;;  %v1591_v58 = vmul.f32 %v1590_v52, %v3864_v9 }
 0x446   :  { %3191 = vmatprep.subr.bf16.mxu0 %v1139_v60 }
 0x449   :  { %3192 = vmatpush3.bf16.msra.mxu0 %v1139_v60  ;;  %v1595_v60 = vrot.slane %v3793_v59, %v1594_v43 }
 0x44a   :  { %3193 = vmatprep.subr.bf16.mxu0 %v1138_v62 }
 0x44b   :  { %v1596_v14 = vadd.f32 %v1595_v60, %v1591_v58 }
 0x44d   :  { %3194 = vmatpush3.bf16.msra.mxu0 %v1138_v62 }
 0x44e   :  { %3195 = vmatprep.subr.bf16.mxu0 %v1137_v63 }
 0x451   :  { %3196 = vmatpush3.bf16.msra.mxu0 %v1137_v63 }
 0x452   :  { %3197 = vmatprep.subr.bf16.mxu0 %v1136_v0 }
 0x455   :  { %3198 = vmatpush3.bf16.msra.mxu0 %v1136_v0 }
 0x458   :  { %3200 = vmatmul.mubr.bf16.vlgmr.msra.gmra.mxu0 %v3842_v1 }
 0x459   :  { %3203 = vmatprep.mubr.bf16.mxu0 %v3844_v3 }
 0x460   :  { %3204 = vmatmul.mubr.bf16.gmra.mxu0 %v3848_v4 }
 0x461   :  { %3207 = vmatprep.mubr.bf16.mxu0 %v3850_v5 }
 0x468   :  { %3208 = vmatmul.mubr.bf16.gmra.mxu0 %v3854_v2 }
 0x469   :  { %3211 = vmatprep.mubr.bf16.mxu0 %v3856_v6 }
 0x470   :  { %3212 = vmatmul.mubr.bf16.gmra.mxu0 %v3860_v7 }
 0x471   :  { %3263 = vmatprep.mubr.bf16.mxu0 %v3411_v53 }
 0x4f8   :  { %v869_v19 = vpop.f32.mrf.mxu0 }
 0x4f9   :  { %v3871_v20 = vmul.f32 %v876_v18, %v869_v19 }
 0x4fa   :  { %v3149_v21 = vpop.f32.mrf.mxu0 }
 0x4fc   :  { %v872_v22 = vpop.f32.mrf.mxu0 }
 0x4fe   :  { %v3150_v23 = vpop.f32.mrf.mxu0 }
 0x4ff   :  { %v1597_v23 = vmax.f32 %v1596_v14, 0.0 }
 0x518   :  { %v3201_v25 = vpop.f32.mrf.mxu0 }
 0x519   :  { %v1239_v48 = vadd.f32 %v3201_v25, %v3875_v26 }
 0x51a   :  { %v1230_v27 = vpop.f32.mrf.mxu0 }
 0x51b   :  { %v1231_v47 = vadd.f32 %v1230_v27, %v3875_v26  ;;  %v1295_v36 = vmax.f32 %v1239_v48, 0.0 }
 0x51c   :  { %v3202_v46 = vpop.f32.mrf.mxu0 }
 0x51d   :  { %v1242_v28 = vadd.f32 %v3202_v46, %v3875_v26  ;;  %v1293_v30 = vmax.f32 %v1231_v47, 0.0  ;;  %v3431_v46 = vld [vmem:[#allocation10 + $0x118] sm:$0xff]  }
 0x51e   :  { %v1233_v49 = vpop.f32.mrf.mxu0 }
 0x51f   :  { %v1234_v50 = vadd.f32 %v1233_v49, %v3875_v26  ;;  %v1296_v29 = vmax.f32 %v1242_v28, 0.0 }
 0x520   :  { %v3205_v51 = vpop.f32.mrf.mxu0 }
 0x521   :  { %v1294_v31 = vmax.f32 %v1234_v50, 0.0  ;;  %v1310_v40 = vpack.c.bf16 %v1296_v29, %v1295_v36  ;;  %v1255_v44 = vadd.f32 %v3205_v51, %v3875_v26  ;;  %v1598_v50 = vpack.c.bf16 %v1597_v23, %v1597_v23 }
 0x522   :  { %v1246_v38 = vpop.f32.mrf.mxu0 }
 0x523   :  { %v1309_v37 = vpack.c.bf16 %v1294_v31, %v1293_v30  ;;  %v1247_v41 = vadd.f32 %v1246_v38, %v3875_v26  ;;  %v1299_v62 = vmax.f32 %v1255_v44, 0.0  ;;  %v3432_v31 = vld [vmem:[#allocation10 + $0x110] sm:$0xff]   ;;  %v1620_v52 = vshrl.u32 %v1598_v50, 16 }
 0x524   :  { %v3206_v34 = vpop.f32.mrf.mxu0 }
 0x525   :  { %v1258_v42 = vadd.f32 %v3206_v34, %v3875_v26  ;;  %3231 = vmatprep.mubr.bf16.mxu1 %v1309_v37  ;;  %v1297_v55 = vmax.f32 %v1247_v41, 0.0  ;;  %v3433_v41 = vld [vmem:[#allocation10 + $0x108] sm:$0xff]  }
 0x526   :  { %v1249_v45 = vpop.f32.mrf.mxu0  ;;  %3232 = vmatmul.mubr.bf16.vlgmr.msra.gmra.mxu1 %v1310_v40 }
 0x527   :  { %v1250_v54 = vadd.f32 %v1249_v45, %v3875_v26  ;;  %3280 = vmatpush3.bf16.msra.mxu1 %v3427_v39  ;;  %v1300_v33 = vmax.f32 %v1258_v42, 0.0  ;;  %v1622_v39 = vshll.u32 %v1598_v50, 16  ;;  %v1617_v50 = vsub.s32 2, %v3790_v57 }
 0x528   :  { %v3209_v53 = vpop.f32.mrf.mxu0  ;;  %3281 = vmatprep.subr.bf16.mxu1 %v3652_v32 }
 0x529   :  { %v1298_v56 = vmax.f32 %v1250_v54, 0.0  ;;  %v1312_v10 = vpack.c.bf16 %v1300_v33, %v1299_v62  ;;  %v1271_v15 = vadd.f32 %v3209_v53, %v3875_v26  ;;  %v1624_v43 = vrot.slane %v1622_v39, 1  ;;  %v3922_v39 = vld [vmem:[#allocation11] sm:$0xff] }
 0x52a   :  { %v1262_v63 = vpop.f32.mrf.mxu0 }
 0x52b   :  { %v1311_v0 = vpack.c.bf16 %v1298_v56, %v1297_v55  ;;  %3282 = vmatpush3.bf16.msra.mxu1 %v3428_v35  ;;  %v1263_v12 = vadd.f32 %v1262_v63, %v3875_v26  ;;  %v1303_v24 = vmax.f32 %v1271_v15, 0.0  ;;  %v1625_v44 = vor.u32 %v1624_v43, %v1620_v52 }
 0x52c   :  { %v3210_v11 = vpop.f32.mrf.mxu0  ;;  %3283 = vmatprep.subr.bf16.mxu1 %v3652_v32 }
 0x52d   :  { %v1274_v13 = vadd.f32 %v3210_v11, %v3875_v26  ;;  %3235 = vmatprep.mubr.bf16.mxu1 %v1311_v0  ;;  %v1301_v21 = vmax.f32 %v1263_v12, 0.0 }
 0x52e   :  { %v1265_v9 = vpop.f32.mrf.mxu0  ;;  %3236 = vmatmul.mubr.bf16.gmra.mxu1 %v1312_v10 }
 0x52f   :  { %v1266_v16 = vadd.f32 %v1265_v9, %v3875_v26  ;;  %3284 = vmatpush3.bf16.msra.mxu1 %v3429_v8  ;;  %v1304_v18 = vmax.f32 %v1274_v13, 0.0 }
 0x530   :  { %v3213_v19 = vpop.f32.mrf.mxu0  ;;  %3285 = vmatprep.subr.bf16.mxu1 %v3652_v32 }
 0x531   :  { %v1302_v22 = vmax.f32 %v1266_v16, 0.0  ;;  %v1314_v47 = vpack.c.bf16 %v1304_v18, %v1303_v24  ;;  %v1287_v29 = vadd.f32 %v3213_v19, %v3875_v26  ;;  %v3435_v24 = vld [vmem:[#allocation10 + $0x238] sm:$0xff]  }
 0x532   :  { %v1278_v25 = vpop.f32.mrf.mxu0 }
 0x533   :  { %v1313_v27 = vpack.c.bf16 %v1302_v22, %v1301_v21  ;;  %3286 = vmatpush3.bf16.msra.mxu1 %v3430_v17  ;;  %v1279_v48 = vadd.f32 %v1278_v25, %v3875_v26  ;;  %v1307_v40 = vmax.f32 %v1287_v29, 0.0  ;;  %v3436_v25 = vld [vmem:[#allocation10 + $0x1f8] sm:$0xff]  }
 0x534   :  { %v3214_v28 = vpop.f32.mrf.mxu0  ;;  %3287 = vmatprep.subr.bf16.mxu1 %v3652_v32  ;;  %v3444_v29 = vld [vmem:[#allocation10 + $0x1d8] sm:$0xff]  }
 0x535   :  { %v1290_v49 = vadd.f32 %v3214_v28, %v3875_v26  ;;  %3239 = vmatprep.mubr.bf16.mxu1 %v1313_v27  ;;  %v1305_v38 = vmax.f32 %v1279_v48, 0.0  ;;  %v3437_v27 = vld [vmem:[#allocation10 + $0x230] sm:$0xff]   ;;  %v3440_v28 = vld [vmem:[#allocation10 + $0x1e8] sm:$0xff]   ;;  %v3441_v48 = vld [vmem:[#allocation10 + $0x220] sm:$0xff]  }
 0x536   :  { %v1281_v51 = vpop.f32.mrf.mxu0  ;;  %3240 = vmatmul.mubr.bf16.gmra.mxu1 %v1314_v47  ;;  %v3439_v47 = vld [vmem:[#allocation10 + $0x228] sm:$0xff]  }
 0x537   :  { %v1282_v30 = vadd.f32 %v1281_v51, %v3875_v26  ;;  %3288 = vmatpush3.bf16.msra.mxu1 %v3431_v46  ;;  %v1308_v36 = vmax.f32 %v1290_v49, 0.0  ;;  %v3434_v26 = vld [vmem:[#allocation10 + $0x100] sm:$0xff]   ;;  %v3438_v46 = vld [vmem:[#allocation10 + $0x1f0] sm:$0xff]  }
 0x538   :  { %3289 = vmatprep.subr.bf16.mxu1 %v3652_v32  ;;  %v3442_v49 = vld [vmem:[#allocation10 + $0x1e0] sm:$0xff]   ;;  %v3445_v51 = vld [vmem:[#allocation10 + $0x210] sm:$0xff]  }
 0x539   :  { %v1306_v37 = vmax.f32 %v1282_v30, 0.0  ;;  %v1316_v42 = vpack.c.bf16 %v1308_v36, %v1307_v40  ;;  %v3448_v36 = vld [vmem:[#allocation10 + $0x1c8] sm:$0xff]  }
 0x53b   :  { %v1315_v34 = vpack.c.bf16 %v1306_v37, %v1305_v38  ;;  %3290 = vmatpush3.bf16.msra.mxu1 %v3432_v31  ;;  %v3446_v31 = vld [vmem:[#allocation10 + $0x1d0] sm:$0xff]   ;;  %v3449_v38 = vld [vmem:[#allocation10 + $0x200] sm:$0xff]   ;;  %v1472_v37 = vsub.s32 6, %v3790_v57 }
 0x53c   :  { %3291 = vmatprep.subr.bf16.mxu1 %v3652_v32 }
 0x53d   :  { %3243 = vmatprep.mubr.bf16.mxu1 %v1315_v34 }
 0x53e   :  { %3244 = vmatmul.mubr.bf16.gmra.mxu1 %v1316_v42 }
 0x53f   :  { %3292 = vmatpush3.bf16.msra.mxu1 %v3433_v41  ;;  %3295 = vmatprep.mubr.msk.bf16.mxu1 %vm3653_vm0, %v3652_v32 }
 0x540   :  { %3293 = vmatprep.subr.bf16.mxu1 %v3652_v32 }
 0x543   :  { %3294 = vmatpush3.bf16.msra.mxu1 %v3434_v26 }
 0x546   :  { %3296 = vmatmul.mubr.bf16.vlgmr.msra.gmra.mxu1 %v1625_v44 }
 0x5e6   :  { %v3233_v45 = vpop.f32.mrf.mxu1 }
 0x5e8   :  { %v1399_v54 = vpop.f32.mrf.mxu1 }
 0x5ea   :  { %v3234_v35 = vpop.f32.mrf.mxu1 }
 0x5eb   :  { %v1463_v22 = vpack.c.bf16 %v3234_v35, %v3233_v45 }
 0x5ec   :  { %v1402_v33 = vpop.f32.mrf.mxu1 }
 0x5ed   :  { %v1462_v23 = vpack.c.bf16 %v1402_v33, %v1399_v54 }
 0x5ee   :  { %v3237_v53 = vpop.f32.mrf.mxu1 }
 0x5f0   :  { %v1415_v55 = vpop.f32.mrf.mxu1 }
 0x5f2   :  { %v3238_v56 = vpop.f32.mrf.mxu1 }
 0x5f3   :  { %v1465_v19 = vpack.c.bf16 %v3238_v56, %v3237_v53 }
 0x5f4   :  { %v1418_v58 = vpop.f32.mrf.mxu1 }
 0x5f5   :  { %v1464_v21 = vpack.c.bf16 %v1418_v58, %v1415_v55 }
 0x5f6   :  { %v3241_v60 = vpop.f32.mrf.mxu1 }
 0x5f8   :  { %v1431_v62 = vpop.f32.mrf.mxu1 }
 0x5fa   :  { %v3242_v63 = vpop.f32.mrf.mxu1 }
 0x5fb   :  { %v1467_v9 = vpack.c.bf16 %v3242_v63, %v3241_v60 }
 0x5fc   :  { %v1434_v0 = vpop.f32.mrf.mxu1 }
 0x5fd   :  { %v1466_v18 = vpack.c.bf16 %v1434_v0, %v1431_v62 }
 0x5fe   :  { %v3245_v8 = vpop.f32.mrf.mxu1 }
 0x600   :  { %v1447_v10 = vpop.f32.mrf.mxu1 }
 0x602   :  { %v3246_v11 = vpop.f32.mrf.mxu1 }
 0x603   :  { %v1469_v12 = vpack.c.bf16 %v3246_v11, %v3245_v8 }
 0x604   :  { %v1450_v32 = vpop.f32.mrf.mxu1 }
 0x605   :  { %v1468_v13 = vpack.c.bf16 %v1450_v32, %v1447_v10  ;;  %3247 = vmatprep.subr.bf16.mxu0 %v1469_v12 }
 0x606   :  { %3248 = vmatpush3.bf16.msra.mxu0 %v1469_v12  ;;  %v1709_v14 = vpop.f32.mrf.mxu1 }
 0x607   :  { %3249 = vmatprep.subr.bf16.mxu0 %v1468_v13 }
 0x608   :  { %v3297_v15 = vpop.f32.mrf.mxu1 }
 0x60a   :  { %3250 = vmatpush3.bf16.msra.mxu0 %v1468_v13  ;;  %v1712_v16 = vpop.f32.mrf.mxu1 }
 0x60b   :  { %3251 = vmatprep.subr.bf16.mxu0 %v1467_v9 }
 0x60c   :  { %v3298_v17 = vpop.f32.mrf.mxu1 }
 0x60e   :  { %3252 = vmatpush3.bf16.msra.mxu0 %v1467_v9 }
 0x60f   :  { %3253 = vmatprep.subr.bf16.mxu0 %v1466_v18 }
 0x612   :  { %3254 = vmatpush3.bf16.msra.mxu0 %v1466_v18 }
 0x613   :  { %3255 = vmatprep.subr.bf16.mxu0 %v1465_v19 }
 0x616   :  { %3256 = vmatpush3.bf16.msra.mxu0 %v1465_v19 }
 0x617   :  { %3257 = vmatprep.subr.bf16.mxu0 %v1464_v21 }
 0x61a   :  { %3258 = vmatpush3.bf16.msra.mxu0 %v1464_v21 }
 0x61b   :  { %3259 = vmatprep.subr.bf16.mxu0 %v1463_v22 }
 0x61e   :  { %3260 = vmatpush3.bf16.msra.mxu0 %v1463_v22 }
 0x61f   :  { %3261 = vmatprep.subr.bf16.mxu0 %v1462_v23 }
 0x622   :  { %3262 = vmatpush3.bf16.msra.mxu0 %v1462_v23 }
 0x623   :  { %2892 = vmatprep.subr.bf16.mxu0 %v3435_v24 }
 0x625   :  { %3264 = vmatmul.mubr.bf16.vlgmr.msra.gmra.mxu0 %v3842_v1  ;;  %v3443_v1 = vld [vmem:[#allocation10 + $0x218] sm:$0xff]  }
 0x626   :  { %2893 = vmatpush3.bf16.msra.mxu0 %v3436_v25  ;;  %3267 = vmatprep.mubr.bf16.mxu0 %v3844_v3  ;;  %v1618_v3 = vrot.slane %v3793_v59, %v1617_v50  ;;  %v3450_v59 = vld [vmem:[#allocation10 + $0x1c0] sm:$0xff]  }
 0x627   :  { %2894 = vmatprep.subr.bf16.mxu0 %v3437_v27 }
 0x628   :  { %v1710_v30 = vadd.f32 %v1709_v14, %v1618_v3 }
 0x62a   :  { %2895 = vmatpush3.bf16.msra.mxu0 %v3438_v46 }
 0x62b   :  { %2896 = vmatprep.subr.bf16.mxu0 %v3439_v47 }
 0x62d   :  { %3268 = vmatmul.mubr.bf16.gmra.mxu0 %v3848_v4  ;;  %v3447_v4 = vld [vmem:[#allocation10 + $0x208] sm:$0xff]  }
 0x62e   :  { %2897 = vmatpush3.bf16.msra.mxu0 %v3440_v28  ;;  %3271 = vmatprep.mubr.bf16.mxu0 %v3850_v5  ;;  %v1716_v5 = vpack.c.bf16 %v1710_v30, %v1710_v30 }
 0x62f   :  { %2898 = vmatprep.subr.bf16.mxu0 %v3441_v48 }
 0x632   :  { %2899 = vmatpush3.bf16.msra.mxu0 %v3442_v49 }
 0x633   :  { %2900 = vmatprep.subr.bf16.mxu0 %v3443_v1 }
 0x635   :  { %3272 = vmatmul.mubr.bf16.gmra.mxu0 %v3854_v2  ;;  %v1715_v2 = vpack.c.bf16 %v3871_v20, %v3871_v20 }
 0x636   :  { %2901 = vmatpush3.bf16.msra.mxu0 %v3444_v29  ;;  %3275 = vmatprep.mubr.bf16.mxu0 %v3856_v6  ;;  %v3451_v6 = vld [vmem:[%s4069_s5] sm:$0xff]  }
 0x637   :  { %2902 = vmatprep.subr.bf16.mxu0 %v3445_v51  ;;  %3301 = vmatprep.mubr.msk.bf16.mxu1 %vm1942_vm1, %v3451_v6 }
 0x63a   :  { %2903 = vmatpush3.bf16.msra.mxu0 %v3446_v31 }
 0x63b   :  { %2904 = vmatprep.subr.bf16.mxu0 %v3447_v4 }
 0x63d   :  { %3276 = vmatmul.mubr.bf16.gmra.mxu0 %v3860_v7  ;;  %v3925_v7 = vrot.slane %v3922_v39, %v1472_v37  ;;  %v3452_v37 = vld [vmem:[%s4069_s5 + $0x8] sm:$0xff]  }
 0x63e   :  { %2905 = vmatpush3.bf16.msra.mxu0 %v3448_v36  ;;  %1877 = vmatprep.mubr.bf16.mxu0 %v1716_v5 }
 0x63f   :  { %2906 = vmatprep.subr.bf16.mxu0 %v3449_v38 }
 0x642   :  { %2907 = vmatpush3.bf16.msra.mxu0 %v3450_v59  ;;  %v3453_v59 = vld [vmem:[#allocation10 + $0x1b8] sm:$0xff]  }
 0x645   :  { %1878 = vmatmul.mubr.bf16.vlgmr.msra.gmra.mxu0 %v1715_v2 }
 0x6e5   :  { %v3265_v40 = vpop.f32.mrf.mxu0 }
 0x6e6   :  { %v1517_v20 = vadd.f32 %v3265_v40, %v3925_v7  ;;  %v3454_v40 = vld [vmem:[#allocation10 + $0x178] sm:$0xff]  }
 0x6e7   :  { %v3927_v34 = vpop.f32.mrf.mxu0 }
 0x6e8   :  { %v1573_v43 = vmax.f32 %v1517_v20, 0.0  ;;  %v3457_v20 = vld [vmem:[%s4069_s5 + $0x10] sm:$0xff]  }
 0x6e9   :  { %v3266_v41 = vpop.f32.mrf.mxu0 }
 0x6ea   :  { %v1520_v42 = vadd.f32 %v3266_v41, %v3925_v7  ;;  %v3455_v41 = vld [vmem:[#allocation10 + $0x1b0] sm:$0xff]  }
 0x6eb   :  { %v3931_v52 = vpop.f32.mrf.mxu0 }
 0x6ec   :  { %v1574_v26 = vmax.f32 %v1520_v42, 0.0  ;;  %v3456_v42 = vld [vmem:[#allocation10 + $0x170] sm:$0xff]  }
 0x6ed   :  { %v3269_v44 = vpop.f32.mrf.mxu0 }
 0x6ee   :  { %v3933_v45 = vpack.c.bf16 %v1574_v26, %v1573_v43  ;;  %v1533_v35 = vadd.f32 %v3269_v44, %v3925_v7  ;;  %v3459_v43 = vld [vmem:[#allocation10 + $0x1a8] sm:$0xff]   ;;  %v3458_v26 = vld [vmem:[%s4069_s5 + $0x18] sm:$0xff]  }
 0x6ef   :  { %v1524_v54 = vpop.f32.mrf.mxu0  ;;  %v3460_v44 = vld [vmem:[#allocation10 + $0x168] sm:$0xff]  }
 0x6f0   :  { %v1525_v53 = vadd.f32 %v1524_v54, %v3925_v7  ;;  %v1577_v58 = vmax.f32 %v1533_v35, 0.0  ;;  %v3463_v54 = vld [vmem:[%s4069_s5 + $0x20] sm:$0xff]  }
 0x6f1   :  { %v3270_v33 = vpop.f32.mrf.mxu0  ;;  %v3461_v35 = vld [vmem:[#allocation10 + $0x1a0] sm:$0xff]  }
 0x6f2   :  { %v1536_v55 = vadd.f32 %v3270_v33, %v3925_v7  ;;  %v1575_v0 = vmax.f32 %v1525_v53, 0.0  ;;  %v3462_v33 = vld [vmem:[#allocation10 + $0x160] sm:$0xff]   ;;  %v3465_v53 = vld [vmem:[#allocation10 + $0x198] sm:$0xff]  }
 0x6f3   :  { %v1527_v56 = vpop.f32.mrf.mxu0 }
 0x6f4   :  { %v1578_v60 = vmax.f32 %v1536_v55, 0.0  ;;  %v1528_v62 = vadd.f32 %v1527_v56, %v3925_v7  ;;  %v3464_v55 = vld [vmem:[%s4069_s5 + $0x28] sm:$0xff]   ;;  %v3466_v56 = vld [vmem:[#allocation10 + $0x158] sm:$0xff]  }
 0x6f5   :  { %v3273_v63 = vpop.f32.mrf.mxu0 }
 0x6f6   :  { %v3939_v8 = vpack.c.bf16 %v1578_v60, %v1577_v58  ;;  %v1576_v10 = vmax.f32 %v1528_v62, 0.0  ;;  %v1549_v32 = vadd.f32 %v3273_v63, %v3925_v7  ;;  %v3469_v58 = vld [vmem:[%s4069_s5 + $0x30] sm:$0xff]   ;;  %v3471_v63 = vld [vmem:[#allocation10 + $0x188] sm:$0xff]  }
 0x6f7   :  { %v1540_v11 = vpop.f32.mrf.mxu0  ;;  %v3467_v60 = vld [vmem:[#allocation10 + $0x190] sm:$0xff]  }
 0x6f8   :  { %v3941_v12 = vpack.c.bf16 %v1576_v10, %v1575_v0  ;;  %v1541_v14 = vadd.f32 %v1540_v11, %v3925_v7  ;;  %v1581_v16 = vmax.f32 %v1549_v32, 0.0  ;;  %v3468_v62 = vld [vmem:[#allocation10 + $0x150] sm:$0xff]   ;;  %v3470_v0 = vld [vmem:[%s4069_s5 + $0x38] sm:$0xff]   ;;  %v3472_v10 = vld [vmem:[#allocation10 + $0x148] sm:$0xff]   ;;  %v1512_v32 = vadd.f32 %v3931_v52, %v3925_v7  ;;  %s3654_s5 = smov [#allocation13]  }
 0x6f9   :  { %v3274_v13 = vpop.f32.mrf.mxu0  ;;  %v3475_v11 = vld [vmem:[#allocation8] sm:$0xff]   ;;  %v3478_v52 = vld [vmem:[#allocation8 + $0x18] sm:$0xff]   ;;  %s2595_s23 = sshll.u32 %s3654_s5, 4  ;;  %s2596_s23 = int_to_ptr.vmem [resolvable:$true] %s2595_s23 }
 0x6fa   :  { %v1552_v15 = vadd.f32 %v3274_v13, %v3925_v7  ;;  %v1579_v21 = vmax.f32 %v1541_v14, 0.0  ;;  %v3473_v13 = vld [vmem:[#allocation10 + $0x180] sm:$0xff]   ;;  %v1509_v14 = vadd.f32 %v3927_v34, %v3925_v7  ;;  %v3480_v34 = vld [vmem:[#allocation8 + $0x28] sm:$0xff]   ;;  %s3612_s24 = scalar_lea.vmem %s2596_s23, 2048  ;;  %p3617_p3 = scmp.lt.s32.totalorder %s2596_s23, %s2596_s23 }
 0x6fb   :  { %v1543_v9 = vpop.f32.mrf.mxu0  ;;  %p3613_p2 = scmp.ne.s32.totalorder %s2596_s23, %s3612_s24  ;;  %p3618_p4 = scmp.lt.s32.totalorder %s3612_s24, %s3612_s24 }
 0x6fc   :  { %v1582_v17 = vmax.f32 %v1552_v15, 0.0  ;;  %v1544_v18 = vadd.f32 %v1543_v9, %v3925_v7  ;;  %v3474_v15 = vld [vmem:[#allocation10 + $0x140] sm:$0xff]   ;;  %v1572_v9 = vmax.f32 %v1512_v32, 0.0 }
 0x6fd   :  { %v3277_v19 = vpop.f32.mrf.mxu0  ;;  %p3619_p5 = por %p3618_p4, %p3617_p3 }
 0x6fe   :  { %v3947_v22 = vpack.c.bf16 %v1582_v17, %v1581_v16  ;;  %v1580_v23 = vmax.f32 %v1544_v18, 0.0  ;;  %v1565_v27 = vadd.f32 %v3277_v19, %v3925_v7  ;;  %v1571_v16 = vmax.f32 %v1509_v14, 0.0  ;;  %v3476_v17 = vld [vmem:[#allocation8 + $0x8] sm:$0xff]   ;;  %v3477_v19 = vld [vmem:[#allocation8 + $0x10] sm:$0xff]  }
 0x6ff   :  { %v1556_v24 = vpop.f32.mrf.mxu0  ;;  %p3620_p6 = pnand %p3619_p5, %p3613_p2 }
 0x700   :  { %v3949_v25 = vpack.c.bf16 %v1580_v23, %v1579_v21  ;;  %v1557_v47 = vadd.f32 %v1556_v24, %v3925_v7  ;;  %v1585_v49 = vmax.f32 %v1565_v27, 0.0  ;;  %v2068_v18 = vpack.c.bf16 %v1572_v9, %v1571_v16  ;;  %v3481_v21 = vld [vmem:[#allocation8 + $0x30] sm:$0xff]   ;;  %v3482_v23 = vld [vmem:[#allocation8 + $0x38] sm:$0xff]   ;;  %v3486_v24 = vld [vmem:[#allocation10 + $0x260] sm:$0xff]  }
 0x701   :  { %v3278_v46 = vpop.f32.mrf.mxu0  ;;  %v3489_v27 = vld [vmem:[#allocation10 + $0x248] sm:$0xff]  }
 0x702   :  { %v1568_v28 = vadd.f32 %v3278_v46, %v3925_v7  ;;  %v1583_v3 = vmax.f32 %v1557_v47, 0.0  ;;  %v3490_v46 = vld [vmem:[#allocation10 + $0x240] sm:$0xff]  }
 0x703   :  { %v1559_v48 = vpop.f32.mrf.mxu0 }
 0x704   :  { %v1586_v50 = vmax.f32 %v1568_v28, 0.0  ;;  %v1560_v1 = vadd.f32 %v1559_v48, %v3925_v7  ;;  %v3479_v7 = vld [vmem:[#allocation8 + $0x20] sm:$0xff]  }
 0x705   :  { %v2908_v29 = vpop.f32.mrf.mxu0 }
 0x706   :  { %v3955_v51 = vpack.c.bf16 %v1586_v50, %v1585_v49  ;;  %v1584_v30 = vmax.f32 %v1560_v1, 0.0 }
 0x707   :  { %v2909_v31 = vpop.f32.mrf.mxu0 }
 0x708   :  { %v3957_v4 = vpack.c.bf16 %v1584_v30, %v1583_v3  ;;  %v2910_v5 = vadd.f32 %v2909_v31, %v2908_v29 }
 0x709   :  { %v2911_v36 = vpop.f32.mrf.mxu0 }
 0x70a   :  { %v1901_v38 = vpack.c.bf16 %v2910_v5, %v2910_v5 }
 0x70b   :  { %v2912_v2 = vpop.f32.mrf.mxu0 }
 0x70c   :  { %v1969_v6 = vsel %vm1967_vm2, %v1901_v38, 0  ;;  %3349 = vmatprep.subr.msk.bf16.mxu1 %vm1967_vm2, %v1901_v38 }
 0x70d   :  { %3300 = vmatpush3.bf16.msra.mxu1 %v1969_v6  ;;  %v2367_v6 = vsub.s32 7, %v3790_v57 }
 0x70e   :  { %2923 = vmatprep.subr.bf16.mxu1 %v3453_v59 }
 0x710   :  { %3302 = vmatmul.mubr.msk.bf16.vlgmr.msra.gmra.mxu1 %vm1942_vm1, %v3452_v37 }
 0x711   :  { %2924 = vmatpush3.bf16.msra.mxu1 %v3454_v40  ;;  %3305 = vmatprep.mubr.msk.bf16.mxu1 %vm1942_vm1, %v3457_v20 }
 0x712   :  { %2925 = vmatprep.subr.bf16.mxu1 %v3455_v41 }
 0x715   :  { %2926 = vmatpush3.bf16.msra.mxu1 %v3456_v42  ;;  %v4016_v42 = vrot.slane %v3922_v39, %v2367_v6 }
 0x716   :  { %2927 = vmatprep.subr.bf16.mxu1 %v3459_v43 }
 0x718   :  { %3306 = vmatmul.mubr.msk.bf16.gmra.mxu1 %vm1942_vm1, %v3458_v26 }
 0x719   :  { %2928 = vmatpush3.bf16.msra.mxu1 %v3460_v44  ;;  %3309 = vmatprep.mubr.msk.bf16.mxu1 %vm1942_vm1, %v3463_v54 }
 0x71a   :  { %2929 = vmatprep.subr.bf16.mxu1 %v3461_v35 }
 0x71d   :  { %2930 = vmatpush3.bf16.msra.mxu1 %v3462_v33 }
 0x71e   :  { %2931 = vmatprep.subr.bf16.mxu1 %v3465_v53 }
 0x720   :  { %3310 = vmatmul.mubr.msk.bf16.gmra.mxu1 %vm1942_vm1, %v3464_v55 }
 0x721   :  { %2932 = vmatpush3.bf16.msra.mxu1 %v3466_v56  ;;  %3313 = vmatprep.mubr.msk.bf16.mxu1 %vm1942_vm1, %v3469_v58 }
 0x722   :  { %2933 = vmatprep.subr.bf16.mxu1 %v3467_v60 }
 0x725   :  { %2934 = vmatpush3.bf16.msra.mxu1 %v3468_v62 }
 0x726   :  { %2935 = vmatprep.subr.bf16.mxu1 %v3471_v63 }
 0x728   :  { %3314 = vmatmul.mubr.msk.bf16.gmra.mxu1 %vm1942_vm1, %v3470_v0 }
 0x729   :  { %2936 = vmatpush3.bf16.msra.mxu1 %v3472_v10  ;;  %2300 = vmatprep.mubr.bf16.mxu1 %v3475_v11 }
 0x72a   :  { %2937 = vmatprep.subr.bf16.mxu1 %v3473_v13 }
 0x72d   :  { %2938 = vmatpush3.bf16.msra.mxu1 %v3474_v15 }
 0x730   :  { %2301 = vmatmul.mubr.bf16.vlgmr.msra.gmra.mxu1 %v2068_v18 }
 0x731   :  { %2308 = vmatprep.mubr.bf16.mxu1 %v3476_v17 }
 0x738   :  { %2309 = vmatmul.mubr.bf16.gmra.mxu1 %v3933_v45  ;;  %v3483_v45 = vld [vmem:[#allocation10 + $0x278] sm:$0xff]  }
 0x739   :  { %2316 = vmatprep.mubr.bf16.mxu1 %v3477_v19  ;;  %3317 = vmatprep.subr.bf16.mxu0 %v3483_v45 }
 0x73a   :  { %3318 = vmatpush3.bf16.msra.mxu0 %v3483_v45 }
 0x740   :  { %2317 = vmatmul.mubr.bf16.gmra.mxu1 %v3941_v12  ;;  %v3484_v12 = vld [vmem:[#allocation10 + $0x270] sm:$0xff]  }
 0x741   :  { %2324 = vmatprep.mubr.bf16.mxu1 %v3478_v52  ;;  %3319 = vmatprep.subr.bf16.mxu0 %v3484_v12 }
 0x742   :  { %3320 = vmatpush3.bf16.msra.mxu0 %v3484_v12 }
 0x748   :  { %2325 = vmatmul.mubr.bf16.gmra.mxu1 %v3939_v8  ;;  %v3485_v8 = vld [vmem:[#allocation10 + $0x268] sm:$0xff]  }
 0x749   :  { %2332 = vmatprep.mubr.bf16.mxu1 %v3479_v7  ;;  %3321 = vmatprep.subr.bf16.mxu0 %v3485_v8 }
 0x74a   :  { %3322 = vmatpush3.bf16.msra.mxu0 %v3485_v8 }
 0x74b   :  { %3323 = vmatprep.subr.bf16.mxu0 %v3486_v24 }
 0x74e   :  { %3324 = vmatpush3.bf16.msra.mxu0 %v3486_v24 }
 0x750   :  { %2333 = vmatmul.mubr.bf16.gmra.mxu1 %v3949_v25  ;;  %v3488_v25 = vld [vmem:[#allocation10 + $0x250] sm:$0xff]  }
 0x751   :  { %2340 = vmatprep.mubr.bf16.mxu1 %v3480_v34 }
 0x758   :  { %2341 = vmatmul.mubr.bf16.gmra.mxu1 %v3947_v22  ;;  %v3487_v22 = vld [vmem:[#allocation10 + $0x258] sm:$0xff]  }
 0x759   :  { %2348 = vmatprep.mubr.bf16.mxu1 %v3481_v21  ;;  %3325 = vmatprep.subr.bf16.mxu0 %v3487_v22 }
 0x75a   :  { %3326 = vmatpush3.bf16.msra.mxu0 %v3487_v22 }
 0x75b   :  { %3327 = vmatprep.subr.bf16.mxu0 %v3488_v25 }
 0x75e   :  { %3328 = vmatpush3.bf16.msra.mxu0 %v3488_v25 }
 0x75f   :  { %3329 = vmatprep.subr.bf16.mxu0 %v3489_v27 }
 0x760   :  { %2349 = vmatmul.mubr.bf16.gmra.mxu1 %v3957_v4 }
 0x761   :  { %2356 = vmatprep.mubr.bf16.mxu1 %v3482_v23 }
 0x762   :  { %3330 = vmatpush3.bf16.msra.mxu0 %v3489_v27 }
 0x763   :  { %3331 = vmatprep.subr.bf16.mxu0 %v3490_v46 }
 0x766   :  { %3332 = vmatpush3.bf16.msra.mxu0 %v3490_v46 }
 0x768   :  { %2357 = vmatmul.mubr.bf16.gmra.mxu1 %v3955_v51 }
 0x7d0   :  { %v3303_v47 = vpop.f32.mrf.mxu1 }
 0x7d2   :  { %v2005_v28 = vpop.f32.mrf.mxu1 }
 0x7d4   :  { %v3304_v48 = vpop.f32.mrf.mxu1 }
 0x7d6   :  { %v2008_v49 = vpop.f32.mrf.mxu1 }
 0x7d8   :  { %v3307_v50 = vpop.f32.mrf.mxu1 }
 0x7da   :  { %v2021_v1 = vpop.f32.mrf.mxu1 }
 0x7dc   :  { %v3308_v29 = vpop.f32.mrf.mxu1 }
 0x7de   :  { %v2024_v3 = vpop.f32.mrf.mxu1 }
 0x7e0   :  { %v3998_v51 = vpop.f32.mrf.mxu1 }
 0x7e2   :  { %v4000_v30 = vpop.f32.mrf.mxu1 }
 0x7e4   :  { %v4002_v31 = vpop.f32.mrf.mxu1 }
 0x7e6   :  { %v4004_v4 = vpop.f32.mrf.mxu1 }
 0x7e8   :  { %v4006_v5 = vpop.f32.mrf.mxu1 }
 0x7ea   :  { %v4008_v36 = vpop.f32.mrf.mxu1 }
 0x7ec   :  { %v4010_v38 = vpop.f32.mrf.mxu1 }
 0x7ee   :  { %v4012_v59 = vpop.f32.mrf.mxu1 }
 0x7f0   :  { %v2939_v2 = vpop.f32.mrf.mxu1 }
 0x7f2   :  { %v2940_v37 = vpop.f32.mrf.mxu1 }
 0x7f3   :  { %v2941_v40 = vadd.f32 %v2940_v37, %v2939_v2 }
 0x7f4   :  { %v2942_v20 = vpop.f32.mrf.mxu1 }
 0x7f5   :  { %v2303_v41 = vadd.f32 %v2941_v40, %v2005_v28 }
 0x7f6   :  { %v2943_v43 = vpop.f32.mrf.mxu1 }
 0x7f7   :  { %v2944_v26 = vadd.f32 %v2943_v43, %v2942_v20  ;;  %v2369_v54 = vadd.f32 %v4016_v42, %v2303_v41 }
 0x7f8   :  { %v2945_v44 = vpop.f32.mrf.mxu1 }
 0x7f9   :  { %v2306_v35 = vadd.f32 %v2944_v26, %v2008_v49  ;;  %v2385_v58 = vmax.f32 %v2369_v54, 0.0 }
 0x7fa   :  { %v2946_v33 = vpop.f32.mrf.mxu1 }
 0x7fb   :  { %v2370_v53 = vadd.f32 %v4016_v42, %v2306_v35  ;;  %v2947_v55 = vadd.f32 %v2946_v33, %v2945_v44 }
 0x7fc   :  { %v2948_v56 = vpop.f32.mrf.mxu1 }
 0x7fd   :  { %v2386_v57 = vmax.f32 %v2370_v53, 0.0  ;;  %v2311_v60 = vadd.f32 %v3303_v47, %v2947_v55 }
 0x7fe   :  { %v2949_v62 = vpop.f32.mrf.mxu1 }
 0x7ff   :  { %v2950_v63 = vadd.f32 %v2949_v62, %v2948_v56  ;;  %v2401_v0 = vpack.c.bf16 %v2386_v57, %v2385_v58  ;;  %v2371_v39 = vadd.f32 %v4016_v42, %v2311_v60 }
 0x800   :  { %v2951_v10 = vpop.f32.mrf.mxu1 }
 0x801   :  { %v2314_v11 = vadd.f32 %v3304_v48, %v2950_v63  ;;  %3333 = vmatprep.mubr.bf16.mxu0 %v2401_v0  ;;  %v2387_v9 = vmax.f32 %v2371_v39, 0.0 }
 0x802   :  { %v2952_v32 = vpop.f32.mrf.mxu1 }
 0x803   :  { %v2372_v13 = vadd.f32 %v4016_v42, %v2314_v11  ;;  %v2953_v14 = vadd.f32 %v2952_v32, %v2951_v10 }
 0x804   :  { %v2954_v15 = vpop.f32.mrf.mxu1 }
 0x805   :  { %v2388_v16 = vmax.f32 %v2372_v13, 0.0  ;;  %v2319_v17 = vadd.f32 %v2953_v14, %v2021_v1 }
 0x806   :  { %v2955_v18 = vpop.f32.mrf.mxu1 }
 0x807   :  { %v2402_v19 = vpack.c.bf16 %v2388_v16, %v2387_v9  ;;  %v2956_v52 = vadd.f32 %v2955_v18, %v2954_v15  ;;  %v2373_v34 = vadd.f32 %v4016_v42, %v2319_v17 }
 0x808   :  { %v2957_v7 = vpop.f32.mrf.mxu1 }
 0x809   :  { %v2322_v21 = vadd.f32 %v2956_v52, %v2024_v3  ;;  %3334 = vmatmul.mubr.bf16.vlgmr.msra.gmra.mxu0 %v2402_v19  ;;  %v2389_v24 = vmax.f32 %v2373_v34, 0.0 }
 0x80a   :  { %v2958_v23 = vpop.f32.mrf.mxu1 }
 0x80b   :  { %v2374_v45 = vadd.f32 %v4016_v42, %v2322_v21  ;;  %v2959_v12 = vadd.f32 %v2958_v23, %v2957_v7 }
 0x80c   :  { %v2960_v8 = vpop.f32.mrf.mxu1 }
 0x80d   :  { %v2390_v22 = vmax.f32 %v2374_v45, 0.0  ;;  %v2327_v25 = vadd.f32 %v3307_v50, %v2959_v12 }
 0x80e   :  { %v2961_v27 = vpop.f32.mrf.mxu1 }
 0x80f   :  { %v2962_v46 = vadd.f32 %v2961_v27, %v2960_v8  ;;  %v2403_v47 = vpack.c.bf16 %v2390_v22, %v2389_v24  ;;  %v2375_v48 = vadd.f32 %v4016_v42, %v2327_v25 }
 0x810   :  { %v2963_v28 = vpop.f32.mrf.mxu1 }
 0x811   :  { %v2330_v49 = vadd.f32 %v3308_v29, %v2962_v46  ;;  %3337 = vmatprep.mubr.bf16.mxu0 %v2403_v47  ;;  %v2391_v37 = vmax.f32 %v2375_v48, 0.0 }
 0x812   :  { %v2964_v1 = vpop.f32.mrf.mxu1 }
 0x813   :  { %v2376_v3 = vadd.f32 %v4016_v42, %v2330_v49  ;;  %v2965_v2 = vadd.f32 %v2964_v1, %v2963_v28 }
 0x814   :  { %v2966_v6 = vpop.f32.mrf.mxu1 }
 0x815   :  { %v2392_v40 = vmax.f32 %v2376_v3, 0.0  ;;  %v2335_v20 = vadd.f32 %v2965_v2, %v4000_v30 }
 0x816   :  { %v2967_v41 = vpop.f32.mrf.mxu1 }
 0x817   :  { %v2968_v43 = vadd.f32 %v2967_v41, %v2966_v6  ;;  %v2404_v50 = vpack.c.bf16 %v2392_v40, %v2391_v37  ;;  %v2377_v44 = vadd.f32 %v4016_v42, %v2335_v20 }
 0x818   :  { %v2969_v26 = vpop.f32.mrf.mxu1 }
 0x819   :  { %v2338_v54 = vadd.f32 %v2968_v43, %v4004_v4  ;;  %3338 = vmatmul.mubr.bf16.gmra.mxu0 %v2404_v50  ;;  %v2393_v55 = vmax.f32 %v2377_v44, 0.0 }
 0x81a   :  { %v2970_v29 = vpop.f32.mrf.mxu1 }
 0x81b   :  { %v2378_v35 = vadd.f32 %v4016_v42, %v2338_v54  ;;  %v2971_v33 = vadd.f32 %v2970_v29, %v2969_v26 }
 0x81c   :  { %v2972_v53 = vpop.f32.mrf.mxu1 }
 0x81d   :  { %v2394_v56 = vmax.f32 %v2378_v35, 0.0  ;;  %v2343_v58 = vadd.f32 %v3998_v51, %v2971_v33 }
 0x81e   :  { %v2973_v57 = vpop.f32.mrf.mxu1 }
 0x81f   :  { %v2974_v30 = vadd.f32 %v2973_v57, %v2972_v53  ;;  %v2405_v60 = vpack.c.bf16 %v2394_v56, %v2393_v55  ;;  %v2379_v63 = vadd.f32 %v4016_v42, %v2343_v58 }
 0x820   :  { %v2975_v62 = vpop.f32.mrf.mxu1 }
 0x821   :  { %v2346_v0 = vadd.f32 %v4002_v31, %v2974_v30  ;;  %3341 = vmatprep.mubr.bf16.mxu0 %v2405_v60  ;;  %v2395_v32 = vmax.f32 %v2379_v63, 0.0 }
 0x822   :  { %v2976_v4 = vpop.f32.mrf.mxu1 }
 0x823   :  { %v2380_v10 = vadd.f32 %v4016_v42, %v2346_v0  ;;  %v2977_v39 = vadd.f32 %v2976_v4, %v2975_v62 }
 0x824   :  { %v2978_v11 = vpop.f32.mrf.mxu1 }
 0x825   :  { %v2396_v13 = vmax.f32 %v2380_v10, 0.0  ;;  %v2351_v14 = vadd.f32 %v2977_v39, %v4008_v36 }
 0x826   :  { %v2979_v15 = vpop.f32.mrf.mxu1 }
 0x827   :  { %v2980_v51 = vadd.f32 %v2979_v15, %v2978_v11  ;;  %v2406_v9 = vpack.c.bf16 %v2396_v13, %v2395_v32  ;;  %v2381_v17 = vadd.f32 %v4016_v42, %v2351_v14 }
 0x828   :  { %v2981_v16 = vpop.f32.mrf.mxu1 }
 0x829   :  { %v2354_v18 = vadd.f32 %v2980_v51, %v4012_v59  ;;  %3342 = vmatmul.mubr.bf16.gmra.mxu0 %v2406_v9  ;;  %v2397_v34 = vmax.f32 %v2381_v17, 0.0 }
 0x82a   :  { %v2982_v31 = vpop.f32.mrf.mxu1 }
 0x82b   :  { %v2382_v19 = vadd.f32 %v4016_v42, %v2354_v18  ;;  %v2983_v52 = vadd.f32 %v2982_v31, %v2981_v16 }
 0x82c   :  { %v2984_v7 = vpop.f32.mrf.mxu1 }
 0x82d   :  { %v2398_v21 = vmax.f32 %v2382_v19, 0.0  ;;  %v2359_v23 = vadd.f32 %v4006_v5, %v2983_v52 }
 0x82e   :  { %v2985_v45 = vpop.f32.mrf.mxu1 }
 0x82f   :  { %v2986_v36 = vadd.f32 %v2985_v45, %v2984_v7  ;;  %v2407_v12 = vpack.c.bf16 %v2398_v21, %v2397_v34  ;;  %v2383_v8 = vadd.f32 %v4016_v42, %v2359_v23 }
 0x831   :  { %v2362_v24 = vadd.f32 %v4010_v38, %v2986_v36  ;;  %3345 = vmatprep.mubr.bf16.mxu0 %v2407_v12  ;;  %v2399_v22 = vmax.f32 %v2383_v8, 0.0 }
 0x833   :  { %v2384_v59 = vadd.f32 %v4016_v42, %v2362_v24 }
 0x835   :  { %v2400_v25 = vmax.f32 %v2384_v59, 0.0 }
 0x837   :  { %v2408_v27 = vpack.c.bf16 %v2400_v25, %v2399_v22 }
 0x839   :  { %3346 = vmatmul.mubr.bf16.gmra.mxu0 %v2408_v27 }
 0x8c9   :  { %v3335_v46 = vpop.f32.mrf.mxu0 }
 0x8ca   :  { %v2520_v47 = vadd.f32 %v3335_v46, %v3867_v61 }
 0x8cb   :  { %v2511_v28 = vpop.f32.mrf.mxu0 }
 0x8cc   :  { %2576 = vst [vmem:[#allocation13 + $0x10] sm:$0xff] %v2520_v47  ;;  %v2512_v5 = vadd.f32 %v2511_v28, %v3867_v61 }
 0x8cd   :  { %v3336_v48 = vpop.f32.mrf.mxu0 }
 0x8ce   :  { %2574 = vst [vmem:[#allocation13] sm:$0xff] %v2512_v5  ;;  %v2523_v49 = vadd.f32 %v3336_v48, %v3867_v61 }
 0x8cf   :  { %v2514_v1 = vpop.f32.mrf.mxu0 }
 0x8d0   :  { %2577 = vst [vmem:[#allocation13 + $0x18] sm:$0xff] %v2523_v49  ;;  %v2515_v38 = vadd.f32 %v2514_v1, %v3867_v61 }
 0x8d2   :  { %2575 = vst [vmem:[#allocation13 + $0x8] sm:$0xff] %v2515_v38 }
 0x8d9   :  { %v3339_v42 = vpop.f32.mrf.mxu0 }
 0x8da   :  { %v2536_v3 = vadd.f32 %v3339_v42, %v3867_v61 }
 0x8db   :  { %v2527_v2 = vpop.f32.mrf.mxu0 }
 0x8dc   :  { %2580 = vst [vmem:[#allocation13 + $0x30] sm:$0xff] %v2536_v3  ;;  %v2528_v6 = vadd.f32 %v2527_v2, %v3867_v61 }
 0x8dd   :  { %v3340_v37 = vpop.f32.mrf.mxu0 }
 0x8de   :  { %2578 = vst [vmem:[#allocation13 + $0x20] sm:$0xff] %v2528_v6  ;;  %v2539_v40 = vadd.f32 %v3340_v37, %v3867_v61 }
 0x8df   :  { %v2530_v20 = vpop.f32.mrf.mxu0 }
 0x8e0   :  { %2581 = vst [vmem:[#allocation13 + $0x38] sm:$0xff] %v2539_v40  ;;  %v2531_v41 = vadd.f32 %v2530_v20, %v3867_v61 }
 0x8e2   :  { %2579 = vst [vmem:[#allocation13 + $0x28] sm:$0xff] %v2531_v41 }
 0x8e9   :  { %v3343_v43 = vpop.f32.mrf.mxu0 }
 0x8ea   :  { %v2552_v50 = vadd.f32 %v3343_v43, %v3867_v61 }
 0x8eb   :  { %v2543_v26 = vpop.f32.mrf.mxu0 }
 0x8ec   :  { %2584 = vst [vmem:[#allocation13 + $0x50] sm:$0xff] %v2552_v50  ;;  %v2544_v44 = vadd.f32 %v2543_v26, %v3867_v61 }
 0x8ed   :  { %v3344_v54 = vpop.f32.mrf.mxu0 }
 0x8ee   :  { %2582 = vst [vmem:[#allocation13 + $0x40] sm:$0xff] %v2544_v44  ;;  %v2555_v29 = vadd.f32 %v3344_v54, %v3867_v61 }
 0x8ef   :  { %v2546_v35 = vpop.f32.mrf.mxu0 }
 0x8f0   :  { %2585 = vst [vmem:[#allocation13 + $0x58] sm:$0xff] %v2555_v29  ;;  %v2547_v33 = vadd.f32 %v2546_v35, %v3867_v61 }
 0x8f2   :  { %2583 = vst [vmem:[#allocation13 + $0x48] sm:$0xff] %v2547_v33 }
 0x8f9   :  { %v3347_v53 = vpop.f32.mrf.mxu0 }
 0x8fa   :  { %v2568_v55 = vadd.f32 %v3347_v53, %v3867_v61 }
 0x8fb   :  { %v2559_v56 = vpop.f32.mrf.mxu0 }
 0x8fc   :  { %2588 = vst [vmem:[#allocation13 + $0x70] sm:$0xff] %v2568_v55  ;;  %v2560_v58 = vadd.f32 %v2559_v56, %v3867_v61 }
 0x8fd   :  { %v3348_v57 = vpop.f32.mrf.mxu0 }
 0x8fe   :  { %2586 = vst [vmem:[#allocation13 + $0x60] sm:$0xff] %v2560_v58  ;;  %v2571_v30 = vadd.f32 %v3348_v57, %v3867_v61 }
 0x8ff   :  { %v2562_v60 = vpop.f32.mrf.mxu0 }
 0x900   :  { %2589 = vst [vmem:[#allocation13 + $0x78] sm:$0xff] %v2571_v30  ;;  %v2563_v62 = vadd.f32 %v2562_v60, %v3867_v61 }
 0x902   :  { %2587 = vst [vmem:[#allocation13 + $0x68] sm:$0xff] %v2563_v62 }
 0x903   :  { %3623 = shalt.err (!%p3620_p6)
}
 0x904   :  { %2601 = dma.vmem_to_hbm [thread:$0]  %s2596_s23, 2048, %s4073_s9, [#allocation4], %s3650_s16, %s3650_s16, %s3651_s17  }
 0x905   :  { %3640 = dma.done.wait [#allocation4], 2048  }
 0x906   :  { %3641 = vsyncadd [#allocation4], 4294965248 }
 0x907   :  { %2605 = vsyncpa [#allocation3], 1 }
 0x908   :  { %2606 = vsyncpa [#allocation6], 1 }
 0x909   :  { %2607 = vsyncpa [#allocation9], 1 }
 0x90a   :  { %2608 = vsyncpa [#allocation12], 1 }
 0x90b   :  { %2609 = vsyncpa [#allocation4], 1 }

</bundles_post_ra>
